<compile_context>
chip_gen: v7x
topology: tpu7x:2x2x1
jax: 0.10.0
libtpu: 0.0.40
codegen_flags: <defaults>
</compile_context>

<pallas_src>
import functools
import math

import jax
import jax.numpy as jnp
from jax.experimental import pallas as pl
from jax.experimental.pallas import tpu as pltpu


def _round_up(x, m):
    return ((x + m - 1) // m) * m


def _mlp_kernel(num_layers, in_dim, out_dim, activation,
                x_ref, w_ref, b_ref, out_ref):
    """One batch tile of the fused MLP (batch-major, standard-form ops only).

    x_ref  : [TILE_N, in_dim]   row-major input tile (natural layout)
    w_ref  : [L+1, H, H]        packed weights; layer i stored TRANSPOSED
                                ([in, out]) and zero-padded to H x H
    b_ref  : [L+1, 1, H]        packed row-vector biases, zero-padded
    out_ref: [TILE_N, out_dim]
    """

    def act(v):
        if activation == "tanh":
            return jnp.tanh(v)
        return jnp.maximum(v, 0.0)  # relu

    x = x_ref[...].astype(jnp.float32)              # [T, in_dim]
    w0 = w_ref[0]                                   # [H, H]  ([in, out] padded)

    # ---- Layer 0 -----------------------------------------------------------
    if in_dim >= 8:
        # Contraction big enough to be worth an MXU pass.
        h = jnp.dot(x, w0[:in_dim, :], preferred_element_type=jnp.float32)
    else:
        # PLL-ROM case (in_dim == 2): expand the tiny contraction as in_dim
        # rank-1 broadcast MACs on the VPU -- avoids a degenerate-K matmul and
        # any in-kernel relayout of the [T, 2] tile.
        h = x[:, 0:1] * w0[0:1, :]                  # [T,1] * [1,H] -> [T,H]
        for k in range(1, in_dim):
            h = h + x[:, k:k + 1] * w0[k:k + 1, :]
    h = act(h + b_ref[0])                           # + [1, H] bias (row bcast)

    # ---- Hidden layers 1 .. num_layers-1 ------------------------------------
    for i in range(1, num_layers):
        h = jnp.dot(h, w_ref[i], preferred_element_type=jnp.float32) + b_ref[i]
        h = act(h)

    # ---- Final linear layer (no activation) ---------------------------------
    o = jnp.dot(h, w_ref[num_layers],
                preferred_element_type=jnp.float32) + b_ref[num_layers]
    out_ref[...] = o[:, :out_dim].astype(out_ref.dtype)


def pack_mlp_params(params):
    """Pack [w0, b0, ..., wL, bL] (w_i: [out, in] PyTorch layout, b_i: [out])
    into two dense, zero-padded slabs.  Do this ONCE, outside the hot path.

    Returns:
      w_slab: [L+1, H, H]  layer i stored transposed ([in, out]).
      b_slab: [L+1, 1, H]  row-vector biases.
    """
    assert len(params) % 2 == 0 and len(params) >= 4
    n_lin = len(params) // 2
    hidden_dim = params[0].shape[0]
    w_slab = jnp.zeros((n_lin, hidden_dim, hidden_dim), jnp.float32)
    b_slab = jnp.zeros((n_lin, 1, hidden_dim), jnp.float32)
    for i in range(n_lin):
        w = jnp.asarray(params[2 * i], jnp.float32)       # [out, in]
        b = jnp.asarray(params[2 * i + 1], jnp.float32)   # [out]
        d_out, d_in = w.shape
        assert d_out <= hidden_dim and d_in <= hidden_dim
        w_slab = w_slab.at[i, :d_in, :d_out].set(w.T)     # store transposed
        b_slab = b_slab.at[i, 0, :d_out].set(b)
    return w_slab, b_slab


def _choose_tiling(n, tile_n):
    """Pick (tile, grid): tile a multiple of 128, grid = ceil(n / tile).

    Large tiles amortize the ~0.35 us per-grid-step pipeline overhead; for
    small grids we also prefer >= 2 and an even number of tiles so
    dimension_semantics=("parallel",) keeps both v7x TensorCores busy
    (no-op on single-core v5e/v6e)."""
    n128 = _round_up(max(n, 1), 128)
    tile = max(128, min(_round_up(tile_n, 128), n128))
    grid = pl.cdiv(n, tile)
    if n128 >= 256 and grid % 2 == 1 and grid <= 8:
        tile = max(128, _round_up(pl.cdiv(n, grid + 1), 128))
        grid = pl.cdiv(n, tile)
    return tile, grid


@functools.partial(jax.jit, static_argnames=("out_dim", "activation", "tile_n"))
def mlp_forward(x, w_slab, b_slab, *, out_dim, activation="tanh", tile_n=4096):
    """Fused MLP forward: y = MLP(x).

    Args:
      x:       [N, input_dim] float32, consumed directly (row-major).
      w_slab:  [L+1, H, H] packed transposed weights (pack_mlp_params).
      b_slab:  [L+1, 1, H] packed biases.
      out_dim: true output width (static; slabs are zero-padded to H).
      activation: 'tanh' or 'relu'.
      tile_n:  target batch tile (multiple of 128).  VMEM stays <~3 MiB at the
               default 4096, so no vmem_limit_bytes override is needed even on
               v7x's 64 MiB part.
    Returns:
      [N, out_dim] float32.
    """
    act = activation.lower()
    if act not in ("tanh", "relu"):
        raise ValueError(f"Unsupported activation: {activation}")

    n, in_dim = x.shape
    n_lin, hidden_dim, _ = w_slab.shape
    num_layers = n_lin - 1
    assert num_layers >= 1
    assert in_dim <= hidden_dim and out_dim <= hidden_dim
    assert b_slab.shape == (n_lin, 1, hidden_dim)

    tile, grid = _choose_tiling(n, tile_n)

    kernel = functools.partial(_mlp_kernel, num_layers, in_dim, out_dim, act)

    return pl.pallas_call(
        kernel,
        out_shape=jax.ShapeDtypeStruct((n, out_dim), jnp.float32),
        grid=(grid,),
        in_specs=[
            # Moving, contiguous batch tile of the row-major input.  The last
            # (ragged) tile is bounds-masked by Pallas; garbage tail rows only
            # affect their own masked-off output rows (row-wise independence).
            pl.BlockSpec((tile, in_dim), lambda i: (i, 0)),
            # Parameters: constant index_map -> DMA'd once, VMEM-resident.
            pl.BlockSpec((n_lin, hidden_dim, hidden_dim), lambda i: (0, 0, 0)),
            pl.BlockSpec((n_lin, 1, hidden_dim), lambda i: (0, 0, 0)),
        ],
        out_specs=pl.BlockSpec((tile, out_dim), lambda i: (i, 0)),
        compiler_params=pltpu.CompilerParams(
            dimension_semantics=("parallel",),  # megacore sharding on v7x
        ),
    )(x.astype(jnp.float32), w_slab, b_slab)


def init_mlp_params(key, input_dim, hidden_dim, output_dim, num_layers):
    """Matches nn.Linear init: w [out, in], b [out], U(-1/sqrt(fan_in), +)."""
    dims = [input_dim] + [hidden_dim] * num_layers + [output_dim]
    params = []
    for i in range(len(dims) - 1):
        d_in, d_out = dims[i], dims[i + 1]
        key, kw, kb = jax.random.split(key, 3)
        bound = 1.0 / math.sqrt(d_in)
        w = jax.random.uniform(kw, (d_out, d_in), jnp.float32, -bound, bound)
        b = jax.random.uniform(kb, (d_out,), jnp.float32, -bound, bound)
        params += [w, b]
    return params


def mlp_forward_ref(x, params, *, activation="tanh"):
    """Pure-JAX reference of the same forward pass (sanity check)."""
    num_layers = len(params) // 2 - 1
    h = x
    for i in range(num_layers + 1):
        w, b = params[2 * i], params[2 * i + 1]
        h = h @ w.T + b
        if i < num_layers:
            h = jnp.tanh(h) if activation == "tanh" else jnp.maximum(h, 0.0)
    return h


# TODO(synk): compute_pde_residual / get_initial_condition_values rely on
# torch.autograd through the network (training-time utilities); they are not
# part of forward() and are left out of the kernel.

if __name__ == "__main__":
    # PLL-ROM PINN shapes: inputs are [t, delta] -> outputs [delta, omega].
    N, INPUT_DIM, HIDDEN_DIM, OUTPUT_DIM, NUM_LAYERS = 300, 2, 32, 2, 3

    key = jax.random.PRNGKey(0)
    key, kx = jax.random.split(key)
    x = jax.random.normal(kx, (N, INPUT_DIM), jnp.float32)
    params = init_mlp_params(key, INPUT_DIM, HIDDEN_DIM, OUTPUT_DIM, NUM_LAYERS)

    # Pack once (host-side), outside the jitted hot path.
    w_slab, b_slab = pack_mlp_params(params)

    # Default tile_n=4096 is clamped to the batch; for N=300 this gives an
    # even 2-step grid (tile=256) and exercises the masked ragged tail.
    y = mlp_forward(x, w_slab, b_slab, out_dim=OUTPUT_DIM, activation="tanh")
    y = jax.block_until_ready(y)

    y_ref = mlp_forward_ref(x, params, activation="tanh")
    assert y.shape == (N, OUTPUT_DIM)
    err = float(jnp.max(jnp.abs(y - y_ref)))
    assert jnp.allclose(y, y_ref, atol=2e-5, rtol=2e-5), err

    print("KERNEL_OK")
</pallas_src>

<mosaic_0001>
module attributes {stable_mosaic.version = 11 : i64} {
  func.func @_mlp_kernel(%arg0: i32, %arg1: memref<256x2xf32, #tpu.memory_space<vmem>>, %arg2: memref<4x32x32xf32, #tpu.memory_space<vmem>>, %arg3: memref<4x1x32xf32, #tpu.memory_space<vmem>>, %arg4: memref<256x2xf32, #tpu.memory_space<vmem>>) attributes {dimension_semantics = [#tpu.dimension_semantics<parallel>], iteration_bounds = array<i64: 2>, scalar_prefetch = 0 : i64, scratch_operands = 0 : i64, tpu.core_type = #tpu.core_type<tc>, window_params = [{transform_indices = @transform_0, window_bounds = array<i64: 256, 2>}, {pipeline_mode = #tpu.pipeline_mode<synchronous>, transform_indices = @transform_1, window_bounds = array<i64: 4, 32, 32>}, {pipeline_mode = #tpu.pipeline_mode<synchronous>, transform_indices = @transform_2, window_bounds = array<i64: 4, 1, 32>}, {transform_indices = @transform_3, window_bounds = array<i64: 256, 2>}]} {
    %c0 = arith.constant 0 : index
    %c0_0 = arith.constant 0 : index
    %0 = vector.load %arg1[%c0, %c0_0] : memref<256x2xf32, #tpu.memory_space<vmem>>, vector<256x2xf32>
    %c0_1 = arith.constant 0 : index
    %c0_2 = arith.constant 0 : index
    %c0_3 = arith.constant 0 : index
    %1 = vector.load %arg2[%c0_1, %c0_2, %c0_3] : memref<4x32x32xf32, #tpu.memory_space<vmem>>, vector<1x32x32xf32>
    %2 = vector.shape_cast %1 : vector<1x32x32xf32> to vector<32x32xf32>
    %3 = vector.extract_strided_slice %0 {offsets = [0, 0], sizes = [256, 1], strides = [1, 1]} : vector<256x2xf32> to vector<256x1xf32>
    %4 = vector.extract_strided_slice %2 {offsets = [0, 0], sizes = [1, 32], strides = [1, 1]} : vector<32x32xf32> to vector<1x32xf32>
    %5 = vector.broadcast %3 : vector<256x1xf32> to vector<256x32xf32>
    %6 = vector.broadcast %4 : vector<1x32xf32> to vector<256x32xf32>
    %7 = arith.mulf %5, %6 : vector<256x32xf32>
    %8 = vector.extract_strided_slice %0 {offsets = [0, 1], sizes = [256, 1], strides = [1, 1]} : vector<256x2xf32> to vector<256x1xf32>
    %9 = vector.extract_strided_slice %2 {offsets = [1, 0], sizes = [1, 32], strides = [1, 1]} : vector<32x32xf32> to vector<1x32xf32>
    %10 = vector.broadcast %8 : vector<256x1xf32> to vector<256x32xf32>
    %11 = vector.broadcast %9 : vector<1x32xf32> to vector<256x32xf32>
    %12 = arith.mulf %10, %11 : vector<256x32xf32>
    %13 = arith.addf %7, %12 : vector<256x32xf32>
    %c0_4 = arith.constant 0 : index
    %c0_5 = arith.constant 0 : index
    %c0_6 = arith.constant 0 : index
    %14 = vector.load %arg3[%c0_4, %c0_5, %c0_6] : memref<4x1x32xf32, #tpu.memory_space<vmem>>, vector<1x1x32xf32>
    %15 = vector.shape_cast %14 : vector<1x1x32xf32> to vector<1x32xf32>
    %16 = vector.broadcast %15 : vector<1x32xf32> to vector<256x32xf32>
    %17 = arith.addf %13, %16 : vector<256x32xf32>
    %18 = math.tanh %17 : vector<256x32xf32>
    %c1 = arith.constant 1 : index
    %c0_7 = arith.constant 0 : index
    %c0_8 = arith.constant 0 : index
    %19 = vector.load %arg2[%c1, %c0_7, %c0_8] : memref<4x32x32xf32, #tpu.memory_space<vmem>>, vector<1x32x32xf32>
    %20 = vector.shape_cast %19 : vector<1x32x32xf32> to vector<32x32xf32>
    %cst = arith.constant dense<0.000000e+00> : vector<256x32xf32>
    %21 = tpu.matmul %18, %20, %cst {dimension_numbers = #tpu.dot_dimension_numbers<[1], [0], [0], [1], [0, 0, 1, 1], [], []>} : vector<256x32xf32>, vector<32x32xf32>, vector<256x32xf32> -> vector<256x32xf32>
    %c1_9 = arith.constant 1 : index
    %c0_10 = arith.constant 0 : index
    %c0_11 = arith.constant 0 : index
    %22 = vector.load %arg3[%c1_9, %c0_10, %c0_11] : memref<4x1x32xf32, #tpu.memory_space<vmem>>, vector<1x1x32xf32>
    %23 = vector.shape_cast %22 : vector<1x1x32xf32> to vector<1x32xf32>
    %24 = vector.broadcast %23 : vector<1x32xf32> to vector<256x32xf32>
    %25 = arith.addf %21, %24 : vector<256x32xf32>
    %26 = math.tanh %25 : vector<256x32xf32>
    %c2 = arith.constant 2 : index
    %c0_12 = arith.constant 0 : index
    %c0_13 = arith.constant 0 : index
    %27 = vector.load %arg2[%c2, %c0_12, %c0_13] : memref<4x32x32xf32, #tpu.memory_space<vmem>>, vector<1x32x32xf32>
    %28 = vector.shape_cast %27 : vector<1x32x32xf32> to vector<32x32xf32>
    %cst_14 = arith.constant dense<0.000000e+00> : vector<256x32xf32>
    %29 = tpu.matmul %26, %28, %cst_14 {dimension_numbers = #tpu.dot_dimension_numbers<[1], [0], [0], [1], [0, 0, 1, 1], [], []>} : vector<256x32xf32>, vector<32x32xf32>, vector<256x32xf32> -> vector<256x32xf32>
    %c2_15 = arith.constant 2 : index
    %c0_16 = arith.constant 0 : index
    %c0_17 = arith.constant 0 : index
    %30 = vector.load %arg3[%c2_15, %c0_16, %c0_17] : memref<4x1x32xf32, #tpu.memory_space<vmem>>, vector<1x1x32xf32>
    %31 = vector.shape_cast %30 : vector<1x1x32xf32> to vector<1x32xf32>
    %32 = vector.broadcast %31 : vector<1x32xf32> to vector<256x32xf32>
    %33 = arith.addf %29, %32 : vector<256x32xf32>
    %34 = math.tanh %33 : vector<256x32xf32>
    %c3 = arith.constant 3 : index
    %c0_18 = arith.constant 0 : index
    %c0_19 = arith.constant 0 : index
    %35 = vector.load %arg2[%c3, %c0_18, %c0_19] : memref<4x32x32xf32, #tpu.memory_space<vmem>>, vector<1x32x32xf32>
    %36 = vector.shape_cast %35 : vector<1x32x32xf32> to vector<32x32xf32>
    %cst_20 = arith.constant dense<0.000000e+00> : vector<256x32xf32>
    %37 = tpu.matmul %34, %36, %cst_20 {dimension_numbers = #tpu.dot_dimension_numbers<[1], [0], [0], [1], [0, 0, 1, 1], [], []>} : vector<256x32xf32>, vector<32x32xf32>, vector<256x32xf32> -> vector<256x32xf32>
    %c3_21 = arith.constant 3 : index
    %c0_22 = arith.constant 0 : index
    %c0_23 = arith.constant 0 : index
    %38 = vector.load %arg3[%c3_21, %c0_22, %c0_23] : memref<4x1x32xf32, #tpu.memory_space<vmem>>, vector<1x1x32xf32>
    %39 = vector.shape_cast %38 : vector<1x1x32xf32> to vector<1x32xf32>
    %40 = vector.broadcast %39 : vector<1x32xf32> to vector<256x32xf32>
    %41 = arith.addf %37, %40 : vector<256x32xf32>
    %42 = vector.extract_strided_slice %41 {offsets = [0, 0], sizes = [256, 2], strides = [1, 1]} : vector<256x32xf32> to vector<256x2xf32>
    %c0_24 = arith.constant 0 : index
    %c0_25 = arith.constant 0 : index
    %43 = vector.load %arg4[%c0_24, %c0_25] : memref<256x2xf32, #tpu.memory_space<vmem>>, vector<256x2xf32>
    tpu.vector_store %arg4[%c0_24, %c0_25], %42 {strides = array<i32>} : memref<256x2xf32, #tpu.memory_space<vmem>>, vector<256x2xf32>,
    return
  }
  func.func @transform_0(%arg0: i32) -> (i32, i32) {
    %c0_i32 = arith.constant 0 : i32
    %c0_i32_0 = arith.constant 0 : i32
    return %arg0, %c0_i32 : i32, i32
  }
  func.func @transform_1(%arg0: i32) -> (i32, i32, i32) {
    %c0_i32 = arith.constant 0 : i32
    %c0_i32_0 = arith.constant 0 : i32
    %c0_i32_1 = arith.constant 0 : i32
    %c0_i32_2 = arith.constant 0 : i32
    return %c0_i32, %c0_i32_0, %c0_i32_1 : i32, i32, i32
  }
  func.func @transform_2(%arg0: i32) -> (i32, i32, i32) {
    %c0_i32 = arith.constant 0 : i32
    %c0_i32_0 = arith.constant 0 : i32
    %c0_i32_1 = arith.constant 0 : i32
    %c0_i32_2 = arith.constant 0 : i32
    return %c0_i32, %c0_i32_0, %c0_i32_1 : i32, i32, i32
  }
  func.func @transform_3(%arg0: i32) -> (i32, i32) {
    %c0_i32 = arith.constant 0 : i32
    %c0_i32_0 = arith.constant 0 : i32
    return %arg0, %c0_i32 : i32, i32
  }
}

</mosaic_0001>

<bundles_post_ra>
// kernel: mlp_forward.1
= control target key start
LH: loop header
LB: loop body
LE: loop exit
PB: predicated region body
PF: predicated region fallthrough
CT: control target
= control target key end

     0   :  { %s2970_s12 = smov 0   ;;  %s2972_s13 = smov 0   ;;  %s3598_s0 = inlined_call_operand.vmem [shape: f32[300,2], index: 0, kind: input, shape index: {}]   ;;  %s3599_s1 = inlined_call_operand.vmem [shape: f32[4,32,32], index: 1, kind: input, shape index: {}]   ;;  %s3600_s2 = inlined_call_operand.vmem [shape: f32[4,1,32], index: 2, kind: input, shape index: {}]   ;;  %s3601_s3 = inlined_call_operand.vmem [shape: f32[300,2], index: 3, kind: output, shape index: {}]  }
   0x1   :  { %s2974_s14 = smov 0  }
   0x2 LB: > { %s2983_s15 = sadd.s32 4294967295, %s2914_s14   ;;  %s2985_s16 = sadd.s32 1, %s2914_s14   ;;  %s2914_s14 = sphi %s2974_s14, %s3610_s14   ;;  %s2910_s13 = sphi %s2972_s13, %s3609_s13   ;;  %s2906_s12 = sphi %s2970_s12, %s3608_s12  }
   0x3   : > { %s85_s17 = ssub.s32 %s2914_s14, %s2985_s16  ;;  %s88_s18 = sadd.s32 1, %s2910_s13 }
   0x4   : > { %p86_p0 = scmp.eq.s32.totalorder %s85_s17, 0  ;;  %p98_p1 = scmp.ne.s32.totalorder %s2910_s13, %s2906_s12 }
   0x5   : > { %p99_p2 = scmp.eq.s32.totalorder %s2983_s15, 1  ;;  %p2130_p3 = scmp.ge.s32.totalorder %s2914_s14, 1 }
   0x6   : > { %s2993_s19 = scalar_select %p86_p0, %s2910_s13, %s88_s18  }
   0x7   : > { %p2995_p4 = por %p99_p2, %p98_p1  ;;  %p146_p5 = scmp.lt.s32.totalorder %s2914_s14, 3 }
   0x9   : > { %p147_p6 = pnand %p2130_p3, %p146_p5 }
   0xa   : > { %s3000_s21 = sshll.u32 (!%p147_p6), %s2983_s15, 5  ;;  %v2948_v0 = vmov (!%p147_p6), 0   ;;  %v2949_v3 = vmov (!%p147_p6), 1   ;;  %v2135_v6 = vld [vmem:[%s3599_s1 + $0x20] sm:$0xff] (!%p147_p6)  ;;  %v2136_v7 = vld [vmem:[%s3599_s1 + $0x28] sm:$0xff] (!%p147_p6)  ;;  %v2137_v10 = vld [vmem:[%s3599_s1 + $0x30] sm:$0xff] (!%p147_p6)  ;;  %v385_v38 = vlaneseq (!%p147_p6) }
   0xb   : > { %150 = sbr.rel (%p147_p6) target bundleno = 1020 (0x3fc), region = 32  ;;  %2665 = vset.pattern.permute.xlu1 (!%p147_p6), %v2948_v0  ;;  %2663 = vset.pattern.permute.xlu0 (!%p147_p6), %v2948_v0  ;;  %p178_p7 = scmp.lt.s32.totalorder (!%p147_p6), %s3000_s21, 37  ;;  %v2545_v9 = vpack.c.bf16 (!%p147_p6), %v2136_v7, %v2135_v6  ;;  %v2138_v11 = vld [vmem:[%s3599_s1 + $0x38] sm:$0xff] (!%p147_p6)  ;;  %v224_v44 = vld [vmem:[%s3599_s1] sm:$0xff] (!%p147_p6)  ;;  %vm701_vm0 = vcmask (!%p147_p6), 261120   ;;  %vm1755_vm1 = vcmask (!%p147_p6), 15360  }
   0xc   : > { %v2549_v13 = vpack.c.bf16 (!%p147_p6), %v2138_v11, %v2137_v10  ;;  %v386_v40 = vshrl.u32 (!%p147_p6), %v385_v38, 7  ;;  %v3067_v55 = vld [vmem:[%s3600_s2] ss:$0 sm:$0xff] (!%p147_p6)  ;;  %s170_s14 = sand.u32 (!%p147_p6), 1, %s2906_s12  }
   0xd   : > { %2546 = vmatprep.subr.bf16.mxu0 (!%p147_p6), %v2545_v9  ;;  %2569 = vmatprep.subr.bf16.mxu1 (!%p147_p6), %v2545_v9  ;;  %s2131_s17 = sshll.u32 (!%p147_p6), %s170_s14, 8 }
   0xe   : > { %2548 = vmatpush3.bf16.msra.mxu0 (!%p147_p6), %v2545_v9  ;;  %2571 = vmatpush3.bf16.msra.mxu1 (!%p147_p6), %v2545_v9  ;;  %v387_v42 = vsub.s32 (!%p147_p6), 0, %v386_v40  ;;  %v551_v43 = vsub.s32 (!%p147_p6), 1, %v386_v40 }
   0xf   : > { %2550 = vmatprep.subr.bf16.mxu0 (!%p147_p6), %v2549_v13  ;;  %2570 = vmatprep.subr.bf16.mxu1 (!%p147_p6), %v2549_v13 }
  0x10   : > { %v3056_v47 = vrot.slane (!%p147_p6), %v224_v44, %v387_v42  ;;  %v3058_v48 = vrot.slane (!%p147_p6), %v224_v44, %v551_v43 }
  0x12   : > { %s179_s22 = scalar_select %p178_p7, %s3000_s21, 37  ;;  %2552 = vmatpush3.bf16.msra.mxu0 %v2549_v13  ;;  %2572 = vmatpush3.bf16.msra.mxu1 %v2549_v13 }
  0x13   : > { %s1796_s12 = ssub.s32 (%p2995_p4), 38, %s3000_s21  ;;  %s2266_s24 = sshll.u32 (%p2995_p4), %s2983_s15, 8 }
  0x14   : > { %s2133_s23 = sshll.u32 %s179_s22, 3  ;;  %p1797_p8 = scmp.lt.s32.totalorder (%p2995_p4), %s1796_s12, 32 }
  0x15   : > { %s3007_s26 = scalar_lea.vmem %s3598_s0, %s2133_s23  ;;  %s3363_s23 = scalar_lea.vmem [#allocation2], %s2131_s17  }
  0x16   : > { %v193_v1 = vld [vmem:[%s3007_s26 + $0x8] sm:$0xff]  ;;  %v192_v2 = vld [vmem:[%s3007_s26] sm:$0xff]  ;;  %v194_v4 = vld [vmem:[%s3007_s26 + $0x10] sm:$0xff]  ;;  %s3466_s27 = scalar_lea.vmem (%p2995_p4), %s3601_s3, %s2266_s24  }
  0x17   : > { %232 = vperm.xlu1 %2665, %v193_v1   ;;  %227 = vperm.xlu0 %2663, %v192_v2   ;;  %v195_v5 = vld [vmem:[%s3007_s26 + $0x18] sm:$0xff]  ;;  %v196_v8 = vld [vmem:[%s3007_s26 + $0x20] sm:$0xff]  ;;  %v197_v12 = vld [vmem:[%s3007_s26 + $0x28] sm:$0xff] }
  0x18   : > { %v198_v14 = vld [vmem:[%s3007_s26 + $0x30] sm:$0xff]  ;;  %v199_v15 = vld [vmem:[%s3007_s26 + $0x38] sm:$0xff]  ;;  %v200_v16 = vld [vmem:[%s3007_s26 + $0x40] sm:$0xff] }
  0x19   : > { %v201_v17 = vld [vmem:[%s3007_s26 + $0x48] sm:$0xff]  ;;  %v202_v18 = vld [vmem:[%s3007_s26 + $0x50] sm:$0xff]  ;;  %v203_v19 = vld [vmem:[%s3007_s26 + $0x58] sm:$0xff] }
  0x1a   : > { %v204_v20 = vld [vmem:[%s3007_s26 + $0x60] sm:$0xff]  ;;  %v205_v21 = vld [vmem:[%s3007_s26 + $0x68] sm:$0xff]  ;;  %v206_v22 = vld [vmem:[%s3007_s26 + $0x70] sm:$0xff] }
  0x1b   : > { %2666 = vset.pattern.permute.xlu1 %v2949_v3  ;;  %2664 = vset.pattern.permute.xlu0 %v2949_v3  ;;  %v207_v23 = vld [vmem:[%s3007_s26 + $0x78] sm:$0xff]  ;;  %v208_v24 = vld [vmem:[%s3007_s26 + $0x80] sm:$0xff]  ;;  %v209_v25 = vld [vmem:[%s3007_s26 + $0x88] sm:$0xff] }
  0x1c   : > { %426 = vperm.xlu1 %2666, %v193_v1   ;;  %422 = vperm.xlu0 %2664, %v192_v2   ;;  %v210_v26 = vld [vmem:[%s3007_s26 + $0x90] sm:$0xff]  ;;  %v211_v27 = vld [vmem:[%s3007_s26 + $0x98] sm:$0xff]  ;;  %v212_v28 = vld [vmem:[%s3007_s26 + $0xa0] sm:$0xff] }
  0x1d   : > { %v213_v29 = vld [vmem:[%s3007_s26 + $0xa8] sm:$0xff]  ;;  %v214_v30 = vld [vmem:[%s3007_s26 + $0xb0] sm:$0xff]  ;;  %v215_v31 = vld [vmem:[%s3007_s26 + $0xb8] sm:$0xff] }
  0x1e   : > { %v216_v32 = vld [vmem:[%s3007_s26 + $0xc0] sm:$0xff]  ;;  %v217_v33 = vld [vmem:[%s3007_s26 + $0xc8] sm:$0xff]  ;;  %v218_v34 = vld [vmem:[%s3007_s26 + $0xd0] sm:$0xff] }
  0x1f   : > { %v219_v35 = vld [vmem:[%s3007_s26 + $0xd8] sm:$0xff]  ;;  %v220_v36 = vld [vmem:[%s3007_s26 + $0xe0] sm:$0xff]  ;;  %v221_v37 = vld [vmem:[%s3007_s26 + $0xe8] sm:$0xff] }
  0x20   : > { %2667 = vset.pattern.permute.xlu1 %v2948_v0  ;;  %430 = vperm.xlu0 %2664, %v194_v4   ;;  %v222_v39 = vld [vmem:[%s3007_s26 + $0xf0] sm:$0xff]  ;;  %v223_v41 = vld [vmem:[%s3007_s26 + $0xf8] sm:$0xff] }
  0x21   : > { %237 = vperm.xlu1 %2667, %v194_v4  }
  0x24   : > { %434 = vperm.xlu0 %2664, %v195_v5  }
  0x25   : > { %242 = vperm.xlu1 %2667, %v195_v5  }
  0x28   : > { %438 = vperm.xlu0 %2664, %v196_v8  }
  0x29   : > { %247 = vperm.xlu1 %2667, %v196_v8  }
  0x2c   : > { %442 = vperm.xlu0 %2664, %v197_v12  }
  0x2d   : > { %252 = vperm.xlu1 %2667, %v197_v12  }
  0x30   : > { %446 = vperm.xlu0 %2664, %v198_v14  }
  0x31   : > { %257 = vperm.xlu1 %2667, %v198_v14  }
  0x34   : > { %450 = vperm.xlu0 %2664, %v199_v15  }
  0x35   : > { %262 = vperm.xlu1 %2667, %v199_v15  }
  0x38   : > { %454 = vperm.xlu0 %2664, %v200_v16  }
  0x39   : > { %267 = vperm.xlu1 %2667, %v200_v16  }
  0x3c   : > { %458 = vperm.xlu0 %2664, %v201_v17  }
  0x3d   : > { %272 = vperm.xlu1 %2667, %v201_v17  }
  0x40   : > { %462 = vperm.xlu0 %2664, %v202_v18  }
  0x41   : > { %277 = vperm.xlu1 %2667, %v202_v18  }
  0x44   : > { %466 = vperm.xlu0 %2664, %v203_v19  }
  0x45   : > { %282 = vperm.xlu1 %2667, %v203_v19  }
  0x48   : > { %470 = vperm.xlu0 %2664, %v204_v20  }
  0x49   : > { %287 = vperm.xlu1 %2667, %v204_v20  }
  0x4c   : > { %474 = vperm.xlu0 %2664, %v205_v21  }
  0x4d   : > { %292 = vperm.xlu1 %2667, %v205_v21  }
  0x50   : > { %478 = vperm.xlu0 %2664, %v206_v22  }
  0x51   : > { %297 = vperm.xlu1 %2667, %v206_v22  }
  0x54   : > { %482 = vperm.xlu0 %2664, %v207_v23  }
  0x55   : > { %302 = vperm.xlu1 %2667, %v207_v23  }
  0x58   : > { %486 = vperm.xlu0 %2664, %v208_v24  }
  0x59   : > { %307 = vperm.xlu1 %2667, %v208_v24  }
  0x5c   : > { %490 = vperm.xlu0 %2664, %v209_v25  }
  0x5d   : > { %312 = vperm.xlu1 %2667, %v209_v25  }
  0x60   : > { %494 = vperm.xlu0 %2664, %v210_v26  }
  0x61   : > { %317 = vperm.xlu1 %2667, %v210_v26  }
  0x64   : > { %498 = vperm.xlu0 %2664, %v211_v27  }
  0x65   : > { %322 = vperm.xlu1 %2667, %v211_v27  }
  0x68   : > { %502 = vperm.xlu0 %2664, %v212_v28  }
  0x69   : > { %327 = vperm.xlu1 %2667, %v212_v28  }
  0x6c   : > { %506 = vperm.xlu0 %2664, %v213_v29  }
  0x6d   : > { %332 = vperm.xlu1 %2667, %v213_v29  }
  0x70   : > { %510 = vperm.xlu0 %2664, %v214_v30  }
  0x71   : > { %337 = vperm.xlu1 %2667, %v214_v30  }
  0x74   : > { %514 = vperm.xlu0 %2664, %v215_v31  }
  0x75   : > { %342 = vperm.xlu1 %2667, %v215_v31  }
  0x78   : > { %518 = vperm.xlu0 %2664, %v216_v32  }
  0x79   : > { %347 = vperm.xlu1 %2667, %v216_v32  }
  0x7c   : > { %522 = vperm.xlu0 %2664, %v217_v33  }
  0x7d   : > { %352 = vperm.xlu1 %2667, %v217_v33  }
  0x80   : > { %526 = vperm.xlu0 %2664, %v218_v34  }
  0x81   : > { %357 = vperm.xlu1 %2667, %v218_v34  }
  0x84   : > { %530 = vperm.xlu0 %2664, %v219_v35  }
  0x85   : > { %362 = vperm.xlu1 %2667, %v219_v35  }
  0x88   : > { %534 = vperm.xlu0 %2664, %v220_v36  }
  0x89   : > { %367 = vperm.xlu1 %2667, %v220_v36  }
  0x8c   : > { %538 = vperm.xlu0 %2664, %v221_v37  }
  0x8d   : > { %372 = vperm.xlu1 %2667, %v221_v37  }
  0x90   : > { %542 = vperm.xlu0 %2664, %v222_v39  }
  0x91   : > { %377 = vperm.xlu1 %2667, %v222_v39  }
  0x94   : > { %546 = vperm.xlu0 %2664, %v223_v41  }
  0x95   : > { %382 = vperm.xlu1 %2667, %v223_v41  }
  0x96   : > { %v233_v45 = vpop.permute.xlu1 %232  ;;  %v228_v46 = vpop.permute.xlu0 %227 }
  0x97   : > { %v390_v51 = vmul.f32 %v3056_v47, %v233_v45  ;;  %v389_v52 = vmul.f32 %v3056_v47, %v228_v46 }
  0x9b   : > { %v427_v49 = vpop.permute.xlu1 %426  ;;  %v423_v50 = vpop.permute.xlu0 %422 }
  0x9c   : > { %v554_v53 = vmul.f32 %v3058_v48, %v427_v49  ;;  %v553_v54 = vmul.f32 %v3058_v48, %v423_v50 }
  0x9e   : > { %v586_v56 = vadd.f32 %v554_v53, %v390_v51  ;;  %v585_v57 = vadd.f32 %v553_v54, %v389_v52 }
  0x9f   : > { %v431_v58 = vpop.permute.xlu0 %430 }
  0xa0   : > { %v625_v59 = vadd.f32 %v3067_v55, %v586_v56  ;;  %v624_v60 = vadd.f32 %v3067_v55, %v585_v57  ;;  %v555_v61 = vmul.f32 %v3058_v48, %v431_v58  ;;  %v238_v62 = vpop.permute.xlu1 %237 }
  0xa1   : > { %v391_v63 = vmul.f32 %v3056_v47, %v238_v62 }
  0xa2   : > { %2668 = vtanh.f32 %v625_v59 }
  0xa3   : > { %2670 = vtanh.f32 %v624_v60  ;;  %v587_v0 = vadd.f32 %v555_v61, %v391_v63  ;;  %v435_v1 = vpop.permute.xlu0 %434 }
  0xa4   : > { %v556_v2 = vmul.f32 %v3058_v48, %v435_v1  ;;  %v243_v3 = vpop.permute.xlu1 %242 }
  0xa5   : > { %v626_v4 = vadd.f32 %v3067_v55, %v587_v0  ;;  %v392_v5 = vmul.f32 %v3056_v47, %v243_v3 }
  0xa7   : > { %2672 = vtanh.f32 %v626_v4  ;;  %v588_v6 = vadd.f32 %v556_v2, %v392_v5  ;;  %v439_v7 = vpop.permute.xlu0 %438 }
  0xa8   : > { %v557_v8 = vmul.f32 %v3058_v48, %v439_v7  ;;  %v248_v9 = vpop.permute.xlu1 %247 }
  0xa9   : > { %v627_v10 = vadd.f32 %v3067_v55, %v588_v6  ;;  %v393_v11 = vmul.f32 %v3056_v47, %v248_v9 }
  0xab   : > { %2674 = vtanh.f32 %v627_v10  ;;  %v589_v12 = vadd.f32 %v557_v8, %v393_v11  ;;  %v443_v13 = vpop.permute.xlu0 %442 }
  0xac   : > { %v2669_v14 = vpop.eup %2668  ;;  %v558_v15 = vmul.f32 %v3058_v48, %v443_v13  ;;  %v253_v16 = vpop.permute.xlu1 %252 }
  0xad   : > { %v2671_v17 = vpop.eup %2670  ;;  %v628_v18 = vadd.f32 %v3067_v55, %v589_v12  ;;  %v394_v19 = vmul.f32 %v3056_v47, %v253_v16 }
  0xae   : > { %2385 = vmatprep.mubr.msk.f32.mxu0 %vm701_vm0, %v2671_v17 }
  0xaf   : > { %2676 = vtanh.f32 %v628_v18  ;;  %v590_v20 = vadd.f32 %v558_v15, %v394_v19  ;;  %2386 = vmatmul.mubr.msk.f32.vlgmr.msra.gmra.mrb[0].mxu0 %vm701_vm0, %v2669_v14  ;;  %v447_v21 = vpop.permute.xlu0 %446 }
  0xb0   : > { %v559_v22 = vmul.f32 %v3058_v48, %v447_v21  ;;  %v258_v23 = vpop.permute.xlu1 %257 }
  0xb1   : > { %v2673_v24 = vpop.eup %2672  ;;  %v629_v25 = vadd.f32 %v3067_v55, %v590_v20  ;;  %v395_v26 = vmul.f32 %v3056_v47, %v258_v23 }
  0xb2   : > { %2388 = vmatprep.mubr.msk.f32.mxu0 %vm701_vm0, %v2673_v24 }
  0xb3   : > { %2678 = vtanh.f32 %v629_v25  ;;  %v591_v27 = vadd.f32 %v559_v22, %v395_v26  ;;  %v451_v28 = vpop.permute.xlu0 %450 }
  0xb4   : > { %v560_v29 = vmul.f32 %v3058_v48, %v451_v28  ;;  %v263_v30 = vpop.permute.xlu1 %262 }
  0xb5   : > { %v2675_v31 = vpop.eup %2674  ;;  %v630_v32 = vadd.f32 %v3067_v55, %v591_v27  ;;  %v396_v33 = vmul.f32 %v3056_v47, %v263_v30 }
  0xb6   : > { %2389 = vmatmul.mubr.msk.f32.gmra.mrb[2].mxu0 %vm701_vm0, %v2675_v31 }
  0xb7   : > { %2680 = vtanh.f32 %v630_v32  ;;  %v592_v34 = vadd.f32 %v560_v29, %v396_v33  ;;  %v455_v35 = vpop.permute.xlu0 %454 }
  0xb8   : > { %v561_v36 = vmul.f32 %v3058_v48, %v455_v35  ;;  %v268_v37 = vpop.permute.xlu1 %267 }
  0xb9   : > { %v2677_v38 = vpop.eup %2676  ;;  %v631_v39 = vadd.f32 %v3067_v55, %v592_v34  ;;  %v397_v40 = vmul.f32 %v3056_v47, %v268_v37 }
  0xba   : > { %2391 = vmatprep.mubr.msk.f32.mxu0 %vm701_vm0, %v2677_v38 }
  0xbb   : > { %2682 = vtanh.f32 %v631_v39  ;;  %v593_v41 = vadd.f32 %v561_v36, %v397_v40  ;;  %v459_v42 = vpop.permute.xlu0 %458 }
  0xbc   : > { %v562_v43 = vmul.f32 %v3058_v48, %v459_v42  ;;  %v273_v44 = vpop.permute.xlu1 %272 }
  0xbd   : > { %v2679_v45 = vpop.eup %2678  ;;  %v632_v46 = vadd.f32 %v3067_v55, %v593_v41  ;;  %v398_v49 = vmul.f32 %v3056_v47, %v273_v44 }
  0xbe   : > { %2392 = vmatmul.mubr.msk.f32.gmra.mrb[4].mxu0 %vm701_vm0, %v2679_v45 }
  0xbf   : > { %2684 = vtanh.f32 %v632_v46  ;;  %v594_v50 = vadd.f32 %v562_v43, %v398_v49  ;;  %v463_v51 = vpop.permute.xlu0 %462 }
  0xc0   : > { %v563_v52 = vmul.f32 %v3058_v48, %v463_v51  ;;  %v278_v53 = vpop.permute.xlu1 %277 }
  0xc1   : > { %v2681_v54 = vpop.eup %2680  ;;  %v633_v56 = vadd.f32 %v3067_v55, %v594_v50  ;;  %v399_v57 = vmul.f32 %v3056_v47, %v278_v53 }
  0xc2   : > { %2394 = vmatprep.mubr.msk.f32.mxu0 %vm701_vm0, %v2681_v54 }
  0xc3   : > { %2686 = vtanh.f32 %v633_v56  ;;  %v595_v58 = vadd.f32 %v563_v52, %v399_v57  ;;  %v467_v59 = vpop.permute.xlu0 %466 }
  0xc4   : > { %v564_v60 = vmul.f32 %v3058_v48, %v467_v59  ;;  %v283_v61 = vpop.permute.xlu1 %282 }
  0xc5   : > { %v2683_v62 = vpop.eup %2682  ;;  %v634_v63 = vadd.f32 %v3067_v55, %v595_v58  ;;  %v400_v0 = vmul.f32 %v3056_v47, %v283_v61 }
  0xc6   : > { %2395 = vmatmul.mubr.msk.f32.gmra.mrb[6].mxu0 %vm701_vm0, %v2683_v62 }
  0xc7   : > { %2688 = vtanh.f32 %v634_v63  ;;  %v596_v1 = vadd.f32 %v564_v60, %v400_v0  ;;  %v471_v2 = vpop.permute.xlu0 %470 }
  0xc8   : > { %v565_v3 = vmul.f32 %v3058_v48, %v471_v2  ;;  %v288_v4 = vpop.permute.xlu1 %287 }
  0xc9   : > { %v2685_v5 = vpop.eup %2684  ;;  %v635_v6 = vadd.f32 %v3067_v55, %v596_v1  ;;  %v401_v7 = vmul.f32 %v3056_v47, %v288_v4 }
  0xca   : > { %2397 = vmatprep.mubr.msk.f32.mxu0 %vm701_vm0, %v2685_v5 }
  0xcb   : > { %2690 = vtanh.f32 %v635_v6  ;;  %v597_v8 = vadd.f32 %v565_v3, %v401_v7  ;;  %v475_v9 = vpop.permute.xlu0 %474 }
  0xcc   : > { %v566_v10 = vmul.f32 %v3058_v48, %v475_v9  ;;  %v293_v11 = vpop.permute.xlu1 %292 }
  0xcd   : > { %v2687_v12 = vpop.eup %2686  ;;  %v636_v13 = vadd.f32 %v3067_v55, %v597_v8  ;;  %v402_v14 = vmul.f32 %v3056_v47, %v293_v11 }
  0xce   : > { %2398 = vmatmul.mubr.msk.f32.gmra.mrb[8].mxu0 %vm701_vm0, %v2687_v12 }
  0xcf   : > { %2692 = vtanh.f32 %v636_v13  ;;  %v598_v15 = vadd.f32 %v566_v10, %v402_v14  ;;  %v479_v16 = vpop.permute.xlu0 %478 }
  0xd0   : > { %v567_v17 = vmul.f32 %v3058_v48, %v479_v16  ;;  %v298_v18 = vpop.permute.xlu1 %297 }
  0xd1   : > { %v2689_v19 = vpop.eup %2688  ;;  %v637_v20 = vadd.f32 %v3067_v55, %v598_v15  ;;  %v403_v21 = vmul.f32 %v3056_v47, %v298_v18 }
  0xd2   : > { %2400 = vmatprep.mubr.msk.f32.mxu0 %vm701_vm0, %v2689_v19 }
  0xd3   : > { %2694 = vtanh.f32 %v637_v20  ;;  %v599_v22 = vadd.f32 %v567_v17, %v403_v21  ;;  %v483_v23 = vpop.permute.xlu0 %482 }
  0xd4   : > { %v568_v24 = vmul.f32 %v3058_v48, %v483_v23  ;;  %v303_v25 = vpop.permute.xlu1 %302 }
  0xd5   : > { %v2691_v26 = vpop.eup %2690  ;;  %v638_v27 = vadd.f32 %v3067_v55, %v599_v22  ;;  %v404_v28 = vmul.f32 %v3056_v47, %v303_v25 }
  0xd6   : > { %2401 = vmatmul.mubr.msk.f32.gmra.mrb[10].mxu0 %vm701_vm0, %v2691_v26 }
  0xd7   : > { %2696 = vtanh.f32 %v638_v27  ;;  %v600_v29 = vadd.f32 %v568_v24, %v404_v28  ;;  %v487_v30 = vpop.permute.xlu0 %486 }
  0xd8   : > { %v569_v31 = vmul.f32 %v3058_v48, %v487_v30  ;;  %v308_v32 = vpop.permute.xlu1 %307 }
  0xd9   : > { %v2693_v33 = vpop.eup %2692  ;;  %v639_v34 = vadd.f32 %v3067_v55, %v600_v29  ;;  %v405_v35 = vmul.f32 %v3056_v47, %v308_v32 }
  0xda   : > { %2403 = vmatprep.mubr.msk.f32.mxu0 %vm701_vm0, %v2693_v33 }
  0xdb   : > { %2698 = vtanh.f32 %v639_v34  ;;  %v601_v36 = vadd.f32 %v569_v31, %v405_v35  ;;  %v491_v37 = vpop.permute.xlu0 %490 }
  0xdc   : > { %v570_v38 = vmul.f32 %v3058_v48, %v491_v37  ;;  %v313_v39 = vpop.permute.xlu1 %312 }
  0xdd   : > { %v2695_v40 = vpop.eup %2694  ;;  %v640_v41 = vadd.f32 %v3067_v55, %v601_v36  ;;  %v406_v42 = vmul.f32 %v3056_v47, %v313_v39 }
  0xde   : > { %2404 = vmatmul.mubr.msk.f32.gmra.mrb[12].mxu0 %vm701_vm0, %v2695_v40 }
  0xdf   : > { %2700 = vtanh.f32 %v640_v41  ;;  %v602_v43 = vadd.f32 %v570_v38, %v406_v42  ;;  %v495_v44 = vpop.permute.xlu0 %494 }
  0xe0   : > { %v571_v45 = vmul.f32 %v3058_v48, %v495_v44  ;;  %v318_v46 = vpop.permute.xlu1 %317 }
  0xe1   : > { %v2697_v49 = vpop.eup %2696  ;;  %v641_v50 = vadd.f32 %v3067_v55, %v602_v43  ;;  %v407_v51 = vmul.f32 %v3056_v47, %v318_v46 }
  0xe2   : > { %2406 = vmatprep.mubr.msk.f32.mxu0 %vm701_vm0, %v2697_v49 }
  0xe3   : > { %2702 = vtanh.f32 %v641_v50  ;;  %v603_v52 = vadd.f32 %v571_v45, %v407_v51  ;;  %v499_v53 = vpop.permute.xlu0 %498 }
  0xe4   : > { %v572_v54 = vmul.f32 %v3058_v48, %v499_v53  ;;  %v323_v56 = vpop.permute.xlu1 %322 }
  0xe5   : > { %v2699_v57 = vpop.eup %2698  ;;  %v642_v58 = vadd.f32 %v3067_v55, %v603_v52  ;;  %v408_v59 = vmul.f32 %v3056_v47, %v323_v56 }
  0xe6   : > { %2407 = vmatmul.mubr.msk.f32.gmra.mrb[14].mxu0 %vm701_vm0, %v2699_v57  ;;  %v2173_v57 = vld [vmem:[%s3599_s1 + $0x40] sm:$0xff] }
  0xe7   : > { %2704 = vtanh.f32 %v642_v58  ;;  %v604_v60 = vadd.f32 %v572_v54, %v408_v59  ;;  %v503_v61 = vpop.permute.xlu0 %502  ;;  %v2174_v58 = vld [vmem:[%s3599_s1 + $0x48] sm:$0xff] }
  0xe8   : > { %v573_v62 = vmul.f32 %v3058_v48, %v503_v61  ;;  %v328_v63 = vpop.permute.xlu1 %327  ;;  %v2553_v61 = vpack.c.bf16 %v2174_v58, %v2173_v57 }
  0xe9   : > { %v2701_v0 = vpop.eup %2700  ;;  %v643_v1 = vadd.f32 %v3067_v55, %v604_v60  ;;  %v409_v2 = vmul.f32 %v3056_v47, %v328_v63 }
  0xea   : > { %2409 = vmatprep.mubr.msk.f32.mxu1 %vm701_vm0, %v2701_v0  ;;  %2554 = vmatprep.subr.bf16.mxu1 %v2553_v61 }
  0xeb   : > { %2706 = vtanh.f32 %v643_v1  ;;  %v605_v3 = vadd.f32 %v573_v62, %v409_v2  ;;  %v507_v4 = vpop.permute.xlu0 %506 }
  0xec   : > { %v574_v5 = vmul.f32 %v3058_v48, %v507_v4  ;;  %v333_v6 = vpop.permute.xlu1 %332  ;;  %v2176_v4 = vld [vmem:[%s3599_s1 + $0x58] sm:$0xff] }
  0xed   : > { %v2703_v7 = vpop.eup %2702  ;;  %v644_v8 = vadd.f32 %v3067_v55, %v605_v3  ;;  %v410_v9 = vmul.f32 %v3056_v47, %v333_v6  ;;  %v2175_v3 = vld [vmem:[%s3599_s1 + $0x50] sm:$0xff] }
  0xee   : > { %2410 = vmatmul.mubr.msk.f32.vlgmr.msra.gmra.mrb[0].mxu1 %vm701_vm0, %v2703_v7  ;;  %v2557_v7 = vpack.c.bf16 %v2176_v4, %v2175_v3 }
  0xef   : > { %2708 = vtanh.f32 %v644_v8  ;;  %v606_v10 = vadd.f32 %v574_v5, %v410_v9  ;;  %v511_v11 = vpop.permute.xlu0 %510  ;;  %2556 = vmatpush3.bf16.msra.mxu1 %v2553_v61 }
  0xf0   : > { %v575_v12 = vmul.f32 %v3058_v48, %v511_v11  ;;  %v338_v13 = vpop.permute.xlu1 %337  ;;  %2558 = vmatprep.subr.bf16.mxu1 %v2557_v7 }
  0xf1   : > { %v2705_v14 = vpop.eup %2704  ;;  %v645_v15 = vadd.f32 %v3067_v55, %v606_v10  ;;  %v411_v16 = vmul.f32 %v3056_v47, %v338_v13 }
  0xf2   : > { %2412 = vmatprep.mubr.msk.f32.mxu1 %vm701_vm0, %v2705_v14 }
  0xf3   : > { %2710 = vtanh.f32 %v645_v15  ;;  %v607_v17 = vadd.f32 %v575_v12, %v411_v16  ;;  %v515_v18 = vpop.permute.xlu0 %514  ;;  %2560 = vmatpush3.bf16.msra.mxu1 %v2557_v7 }
  0xf4   : > { %v576_v19 = vmul.f32 %v3058_v48, %v515_v18  ;;  %v343_v20 = vpop.permute.xlu1 %342 }
  0xf5   : > { %v2707_v21 = vpop.eup %2706  ;;  %v646_v22 = vadd.f32 %v3067_v55, %v607_v17  ;;  %v412_v23 = vmul.f32 %v3056_v47, %v343_v20 }
  0xf6   : > { %2413 = vmatmul.mubr.msk.f32.gmra.mrb[2].mxu1 %vm701_vm0, %v2707_v21 }
  0xf7   : > { %2712 = vtanh.f32 %v646_v22  ;;  %v608_v24 = vadd.f32 %v576_v19, %v412_v23  ;;  %v519_v25 = vpop.permute.xlu0 %518 }
  0xf8   : > { %v577_v26 = vmul.f32 %v3058_v48, %v519_v25  ;;  %v348_v27 = vpop.permute.xlu1 %347 }
  0xf9   : > { %v2709_v28 = vpop.eup %2708  ;;  %v647_v29 = vadd.f32 %v3067_v55, %v608_v24  ;;  %v413_v30 = vmul.f32 %v3056_v47, %v348_v27 }
  0xfa   : > { %2415 = vmatprep.mubr.msk.f32.mxu1 %vm701_vm0, %v2709_v28 }
  0xfb   : > { %2714 = vtanh.f32 %v647_v29  ;;  %v609_v31 = vadd.f32 %v577_v26, %v413_v30  ;;  %v523_v32 = vpop.permute.xlu0 %522 }
  0xfc   : > { %v578_v33 = vmul.f32 %v3058_v48, %v523_v32  ;;  %v353_v34 = vpop.permute.xlu1 %352 }
  0xfd   : > { %v2711_v35 = vpop.eup %2710  ;;  %v648_v36 = vadd.f32 %v3067_v55, %v609_v31  ;;  %v414_v37 = vmul.f32 %v3056_v47, %v353_v34 }
  0xfe   : > { %2416 = vmatmul.mubr.msk.f32.gmra.mrb[4].mxu1 %vm701_vm0, %v2711_v35 }
  0xff   : > { %2716 = vtanh.f32 %v648_v36  ;;  %v610_v38 = vadd.f32 %v578_v33, %v414_v37  ;;  %v527_v39 = vpop.permute.xlu0 %526 }
 0x100   : > { %v579_v40 = vmul.f32 %v3058_v48, %v527_v39  ;;  %v358_v41 = vpop.permute.xlu1 %357 }
 0x101   : > { %v2713_v42 = vpop.eup %2712  ;;  %v649_v43 = vadd.f32 %v3067_v55, %v610_v38  ;;  %v415_v44 = vmul.f32 %v3056_v47, %v358_v41 }
 0x102   : > { %2418 = vmatprep.mubr.msk.f32.mxu1 %vm701_vm0, %v2713_v42 }
 0x103   : > { %2718 = vtanh.f32 %v649_v43  ;;  %v611_v45 = vadd.f32 %v579_v40, %v415_v44  ;;  %v531_v46 = vpop.permute.xlu0 %530 }
 0x104   : > { %v580_v49 = vmul.f32 %v3058_v48, %v531_v46  ;;  %v363_v50 = vpop.permute.xlu1 %362 }
 0x105   : > { %v2715_v51 = vpop.eup %2714  ;;  %v650_v52 = vadd.f32 %v3067_v55, %v611_v45  ;;  %v416_v53 = vmul.f32 %v3056_v47, %v363_v50 }
 0x106   : > { %2419 = vmatmul.mubr.msk.f32.gmra.mrb[6].mxu1 %vm701_vm0, %v2715_v51 }
 0x107   : > { %2720 = vtanh.f32 %v650_v52  ;;  %v612_v54 = vadd.f32 %v580_v49, %v416_v53  ;;  %v535_v56 = vpop.permute.xlu0 %534 }
 0x108   : > { %v581_v59 = vmul.f32 %v3058_v48, %v535_v56  ;;  %v368_v60 = vpop.permute.xlu1 %367 }
 0x109   : > { %v2717_v62 = vpop.eup %2716  ;;  %v651_v63 = vadd.f32 %v3067_v55, %v612_v54  ;;  %v417_v0 = vmul.f32 %v3056_v47, %v368_v60 }
 0x10a   : > { %2421 = vmatprep.mubr.msk.f32.mxu1 %vm701_vm0, %v2717_v62 }
 0x10b   : > { %2722 = vtanh.f32 %v651_v63  ;;  %v613_v1 = vadd.f32 %v581_v59, %v417_v0  ;;  %v539_v2 = vpop.permute.xlu0 %538 }
 0x10c   : > { %v582_v5 = vmul.f32 %v3058_v48, %v539_v2  ;;  %v373_v6 = vpop.permute.xlu1 %372 }
 0x10d   : > { %v2719_v8 = vpop.eup %2718  ;;  %v652_v9 = vadd.f32 %v3067_v55, %v613_v1  ;;  %v418_v10 = vmul.f32 %v3056_v47, %v373_v6 }
 0x10e   : > { %2422 = vmatmul.mubr.msk.f32.gmra.mrb[8].mxu1 %vm701_vm0, %v2719_v8 }
 0x10f   : > { %2724 = vtanh.f32 %v652_v9  ;;  %v614_v11 = vadd.f32 %v582_v5, %v418_v10  ;;  %v543_v12 = vpop.permute.xlu0 %542 }
 0x110   : > { %v583_v13 = vmul.f32 %v3058_v48, %v543_v12  ;;  %v378_v14 = vpop.permute.xlu1 %377 }
 0x111   : > { %v2721_v15 = vpop.eup %2720  ;;  %v653_v16 = vadd.f32 %v3067_v55, %v614_v11  ;;  %v419_v17 = vmul.f32 %v3056_v47, %v378_v14 }
 0x112   : > { %2424 = vmatprep.mubr.msk.f32.mxu1 %vm701_vm0, %v2721_v15 }
 0x113   : > { %2726 = vtanh.f32 %v653_v16  ;;  %v615_v18 = vadd.f32 %v583_v13, %v419_v17  ;;  %v547_v19 = vpop.permute.xlu0 %546 }
 0x114   : > { %v584_v20 = vmul.f32 %v3058_v48, %v547_v19  ;;  %v383_v21 = vpop.permute.xlu1 %382 }
 0x115   : > { %v2723_v22 = vpop.eup %2722  ;;  %v654_v23 = vadd.f32 %v3067_v55, %v615_v18  ;;  %v420_v24 = vmul.f32 %v3056_v47, %v383_v21  ;;  %v3208_v47 = vld [vmem:[%s3600_s2 + $0x1] ss:$0 sm:$0xff] }
 0x116   : > { %2425 = vmatmul.mubr.msk.f32.gmra.mrb[10].mxu1 %vm701_vm0, %v2723_v22 }
 0x117   : > { %2728 = vtanh.f32 %v654_v23  ;;  %v616_v25 = vadd.f32 %v584_v20, %v420_v24 }
 0x119   : > { %v2725_v26 = vpop.eup %2724  ;;  %v655_v27 = vadd.f32 %v3067_v55, %v616_v25 }
 0x11a   : > { %2427 = vmatprep.mubr.msk.f32.mxu1 %vm701_vm0, %v2725_v26 }
 0x11b   : > { %2730 = vtanh.f32 %v655_v27 }
 0x11d   : > { %v2727_v28 = vpop.eup %2726 }
 0x11e   : > { %2428 = vmatmul.mubr.msk.f32.gmra.mrb[12].mxu1 %vm701_vm0, %v2727_v28 }
 0x121   : > { %v2729_v48 = vpop.eup %2728 }
 0x122   : > { %2430 = vmatprep.mubr.msk.f32.mxu1 %vm701_vm0, %v2729_v48 }
 0x125   : > { %v2731_v29 = vpop.eup %2730 }
 0x126   : > { %2431 = vmatmul.mubr.msk.f32.gmra.mrb[14].mxu1 %vm701_vm0, %v2731_v29 }
 0x182   : > { %v2387_v30 = vpop.f32.mrb[0].mxu0 }
 0x183   : > { %v870_v55 = vadd.f32 %v2387_v30, %v3208_v47  ;;  %v864_v31 = vpop.f32.mrb[1].mxu0 }
 0x184   : > { %v865_v32 = vadd.f32 %v3208_v47, %v864_v31 }
 0x186   : > { %2732 = vtanh.f32 %v865_v32 }
 0x187   : > { %2734 = vtanh.f32 %v870_v55 }
 0x189   : > { %v2390_v33 = vpop.f32.mrb[2].mxu0 }
 0x18a   : > { %v880_v34 = vadd.f32 %v2390_v33, %v3208_v47  ;;  %v874_v35 = vpop.f32.mrb[3].mxu0 }
 0x18b   : > { %v875_v36 = vadd.f32 %v3208_v47, %v874_v35 }
 0x18d   : > { %2736 = vtanh.f32 %v875_v36 }
 0x18e   : > { %2738 = vtanh.f32 %v880_v34 }
 0x190   : > { %v2733_v37 = vpop.eup %2732 }
 0x191   : > { %v2735_v38 = vpop.eup %2734  ;;  %2441 = vmatprep.mubr.msk.f32.mxu1 %vm701_vm0, %v2733_v37  ;;  %v2393_v39 = vpop.f32.mrb[4].mxu0 }
 0x192   : > { %v890_v40 = vadd.f32 %v2393_v39, %v3208_v47  ;;  %2442 = vmatmul.mubr.msk.f32.vlgmr.msra.gmra.mrb[16].mxu1 %vm701_vm0, %v2735_v38  ;;  %v884_v41 = vpop.f32.mrb[5].mxu0 }
 0x193   : > { %v885_v42 = vadd.f32 %v3208_v47, %v884_v41 }
 0x195   : > { %2740 = vtanh.f32 %v885_v42 }
 0x196   : > { %2742 = vtanh.f32 %v890_v40 }
 0x197   : > { %v2737_v43 = vpop.eup %2736 }
 0x198   : > { %v2739_v44 = vpop.eup %2738  ;;  %2444 = vmatprep.mubr.msk.f32.mxu1 %vm701_vm0, %v2737_v43 }
 0x199   : > { %v2396_v45 = vpop.f32.mrb[6].mxu0  ;;  %2445 = vmatmul.mubr.msk.f32.gmra.mrb[18].mxu1 %vm701_vm0, %v2739_v44 }
 0x19a   : > { %v900_v46 = vadd.f32 %v2396_v45, %v3208_v47  ;;  %v894_v49 = vpop.f32.mrb[7].mxu0  ;;  %v2211_v45 = vld [vmem:[%s3599_s1 + $0x60] sm:$0xff] }
 0x19b   : > { %v895_v50 = vadd.f32 %v3208_v47, %v894_v49 }
 0x19d   : > { %2744 = vtanh.f32 %v895_v50 }
 0x19e   : > { %2746 = vtanh.f32 %v900_v46  ;;  %v2212_v46 = vld [vmem:[%s3599_s1 + $0x68] sm:$0xff] }
 0x19f   : > { %v2741_v51 = vpop.eup %2740  ;;  %v2561_v50 = vpack.c.bf16 %v2212_v46, %v2211_v45 }
 0x1a0   : > { %v2743_v52 = vpop.eup %2742  ;;  %2447 = vmatprep.mubr.msk.f32.mxu1 %vm701_vm0, %v2741_v51  ;;  %v2213_v51 = vld [vmem:[%s3599_s1 + $0x70] sm:$0xff] }
 0x1a1   : > { %v2399_v53 = vpop.f32.mrb[8].mxu0  ;;  %2448 = vmatmul.mubr.msk.f32.gmra.mrb[20].mxu1 %vm701_vm0, %v2743_v52  ;;  %2562 = vmatprep.subr.bf16.mxu0 %v2561_v50  ;;  %v2214_v52 = vld [vmem:[%s3599_s1 + $0x78] sm:$0xff] }
 0x1a2   : > { %v910_v54 = vadd.f32 %v2399_v53, %v3208_v47  ;;  %v904_v56 = vpop.f32.mrb[9].mxu0  ;;  %2564 = vmatpush3.bf16.msra.mxu0 %v2561_v50 }
 0x1a3   : > { %v905_v57 = vadd.f32 %v3208_v47, %v904_v56 }
 0x1a5   : > { %2748 = vtanh.f32 %v905_v57 }
 0x1a6   : > { %2750 = vtanh.f32 %v910_v54  ;;  %v2565_v54 = vpack.c.bf16 %v2214_v52, %v2213_v51 }
 0x1a7   : > { %v2745_v58 = vpop.eup %2744 }
 0x1a8   : > { %v2747_v59 = vpop.eup %2746  ;;  %2450 = vmatprep.mubr.msk.f32.mxu1 %vm701_vm0, %v2745_v58  ;;  %2566 = vmatprep.subr.bf16.mxu0 %v2565_v54 }
 0x1a9   : > { %v2402_v60 = vpop.f32.mrb[10].mxu0  ;;  %2451 = vmatmul.mubr.msk.f32.gmra.mrb[22].mxu1 %vm701_vm0, %v2747_v59  ;;  %2568 = vmatpush3.bf16.msra.mxu0 %v2565_v54 }
 0x1aa   : > { %v920_v61 = vadd.f32 %v2402_v60, %v3208_v47  ;;  %v914_v62 = vpop.f32.mrb[11].mxu0 }
 0x1ab   : > { %v915_v63 = vadd.f32 %v3208_v47, %v914_v62 }
 0x1ad   : > { %2752 = vtanh.f32 %v915_v63 }
 0x1ae   : > { %2754 = vtanh.f32 %v920_v61 }
 0x1af   : > { %v2749_v0 = vpop.eup %2748 }
 0x1b0   : > { %v2751_v1 = vpop.eup %2750  ;;  %2453 = vmatprep.mubr.msk.f32.mxu1 %vm701_vm0, %v2749_v0 }
 0x1b1   : > { %v2405_v2 = vpop.f32.mrb[12].mxu0  ;;  %2454 = vmatmul.mubr.msk.f32.gmra.mrb[24].mxu1 %vm701_vm0, %v2751_v1 }
 0x1b2   : > { %v930_v3 = vadd.f32 %v2405_v2, %v3208_v47  ;;  %v924_v4 = vpop.f32.mrb[13].mxu0 }
 0x1b3   : > { %v925_v5 = vadd.f32 %v3208_v47, %v924_v4 }
 0x1b5   : > { %2756 = vtanh.f32 %v925_v5 }
 0x1b6   : > { %2758 = vtanh.f32 %v930_v3 }
 0x1b7   : > { %v2753_v6 = vpop.eup %2752 }
 0x1b8   : > { %v2755_v7 = vpop.eup %2754  ;;  %2456 = vmatprep.mubr.msk.f32.mxu1 %vm701_vm0, %v2753_v6 }
 0x1b9   : > { %v2408_v8 = vpop.f32.mrb[14].mxu0  ;;  %2457 = vmatmul.mubr.msk.f32.gmra.mrb[26].mxu1 %vm701_vm0, %v2755_v7  ;;  %v3289_v7 = vld [vmem:[%s3600_s2 + $0x2] ss:$0 sm:$0xff] }
 0x1ba   : > { %v940_v9 = vadd.f32 %v2408_v8, %v3208_v47  ;;  %v934_v10 = vpop.f32.mrb[15].mxu0 }
 0x1bb   : > { %v935_v11 = vadd.f32 %v3208_v47, %v934_v10 }
 0x1bd   : > { %2760 = vtanh.f32 %v935_v11 }
 0x1be   : > { %2762 = vtanh.f32 %v940_v9 }
 0x1bf   : > { %v2757_v12 = vpop.eup %2756 }
 0x1c0   : > { %v2759_v13 = vpop.eup %2758  ;;  %2459 = vmatprep.mubr.msk.f32.mxu1 %vm701_vm0, %v2757_v12 }
 0x1c1   : > { %v2411_v14 = vpop.f32.mrb[0].mxu1  ;;  %2460 = vmatmul.mubr.msk.f32.gmra.mrb[28].mxu1 %vm701_vm0, %v2759_v13 }
 0x1c2   : > { %v950_v15 = vadd.f32 %v2411_v14, %v3208_v47  ;;  %v944_v16 = vpop.f32.mrb[1].mxu1 }
 0x1c3   : > { %v945_v17 = vadd.f32 %v3208_v47, %v944_v16 }
 0x1c5   : > { %2764 = vtanh.f32 %v945_v17 }
 0x1c6   : > { %2766 = vtanh.f32 %v950_v15 }
 0x1c7   : > { %v2761_v18 = vpop.eup %2760 }
 0x1c8   : > { %v2763_v19 = vpop.eup %2762  ;;  %2462 = vmatprep.mubr.msk.f32.mxu1 %vm701_vm0, %v2761_v18 }
 0x1c9   : > { %v2414_v20 = vpop.f32.mrb[2].mxu1  ;;  %2463 = vmatmul.mubr.msk.f32.gmra.mrb[30].mxu1 %vm701_vm0, %v2763_v19 }
 0x1ca   : > { %v960_v21 = vadd.f32 %v2414_v20, %v3208_v47  ;;  %v954_v22 = vpop.f32.mrb[3].mxu1 }
 0x1cb   : > { %v955_v23 = vadd.f32 %v3208_v47, %v954_v22 }
 0x1cd   : > { %2768 = vtanh.f32 %v955_v23 }
 0x1ce   : > { %2770 = vtanh.f32 %v960_v21 }
 0x1cf   : > { %v2765_v24 = vpop.eup %2764 }
 0x1d0   : > { %v2767_v25 = vpop.eup %2766  ;;  %2465 = vmatprep.mubr.msk.f32.mxu1 %vm701_vm0, %v2765_v24 }
 0x1d1   : > { %v2417_v26 = vpop.f32.mrb[4].mxu1  ;;  %2466 = vmatmul.mubr.msk.f32.gmra.mrb[32].mxu1 %vm701_vm0, %v2767_v25 }
 0x1d2   : > { %v970_v27 = vadd.f32 %v2417_v26, %v3208_v47  ;;  %v964_v28 = vpop.f32.mrb[5].mxu1 }
 0x1d3   : > { %v965_v48 = vadd.f32 %v3208_v47, %v964_v28 }
 0x1d5   : > { %2772 = vtanh.f32 %v965_v48 }
 0x1d6   : > { %2774 = vtanh.f32 %v970_v27 }
 0x1d7   : > { %v2769_v29 = vpop.eup %2768 }
 0x1d8   : > { %v2771_v30 = vpop.eup %2770  ;;  %2468 = vmatprep.mubr.msk.f32.mxu1 %vm701_vm0, %v2769_v29 }
 0x1d9   : > { %v2420_v55 = vpop.f32.mrb[6].mxu1  ;;  %2469 = vmatmul.mubr.msk.f32.gmra.mrb[34].mxu1 %vm701_vm0, %v2771_v30 }
 0x1da   : > { %v980_v31 = vadd.f32 %v2420_v55, %v3208_v47  ;;  %v974_v32 = vpop.f32.mrb[7].mxu1 }
 0x1db   : > { %v975_v33 = vadd.f32 %v3208_v47, %v974_v32 }
 0x1dd   : > { %2776 = vtanh.f32 %v975_v33 }
 0x1de   : > { %2778 = vtanh.f32 %v980_v31 }
 0x1df   : > { %v2773_v34 = vpop.eup %2772 }
 0x1e0   : > { %v2775_v35 = vpop.eup %2774  ;;  %2471 = vmatprep.mubr.msk.f32.mxu1 %vm701_vm0, %v2773_v34 }
 0x1e1   : > { %v2423_v36 = vpop.f32.mrb[8].mxu1  ;;  %2472 = vmatmul.mubr.msk.f32.gmra.mrb[36].mxu1 %vm701_vm0, %v2775_v35 }
 0x1e2   : > { %v990_v37 = vadd.f32 %v2423_v36, %v3208_v47  ;;  %v984_v38 = vpop.f32.mrb[9].mxu1 }
 0x1e3   : > { %v985_v39 = vadd.f32 %v3208_v47, %v984_v38 }
 0x1e5   : > { %2780 = vtanh.f32 %v985_v39 }
 0x1e6   : > { %2782 = vtanh.f32 %v990_v37 }
 0x1e7   : > { %v2777_v40 = vpop.eup %2776 }
 0x1e8   : > { %v2779_v41 = vpop.eup %2778  ;;  %2474 = vmatprep.mubr.msk.f32.mxu1 %vm701_vm0, %v2777_v40 }
 0x1e9   : > { %v2426_v42 = vpop.f32.mrb[10].mxu1  ;;  %2475 = vmatmul.mubr.msk.f32.gmra.mrb[38].mxu1 %vm701_vm0, %v2779_v41 }
 0x1ea   : > { %v1000_v43 = vadd.f32 %v2426_v42, %v3208_v47  ;;  %v994_v44 = vpop.f32.mrb[11].mxu1 }
 0x1eb   : > { %v995_v49 = vadd.f32 %v3208_v47, %v994_v44 }
 0x1ed   : > { %2784 = vtanh.f32 %v995_v49 }
 0x1ee   : > { %2786 = vtanh.f32 %v1000_v43 }
 0x1ef   : > { %v2781_v53 = vpop.eup %2780 }
 0x1f0   : > { %v2783_v56 = vpop.eup %2782  ;;  %2477 = vmatprep.mubr.msk.f32.mxu1 %vm701_vm0, %v2781_v53 }
 0x1f1   : > { %v2429_v57 = vpop.f32.mrb[12].mxu1  ;;  %2478 = vmatmul.mubr.msk.f32.gmra.mrb[40].mxu1 %vm701_vm0, %v2783_v56 }
 0x1f2   : > { %v1010_v58 = vadd.f32 %v2429_v57, %v3208_v47  ;;  %v1004_v59 = vpop.f32.mrb[13].mxu1 }
 0x1f3   : > { %v1005_v60 = vadd.f32 %v3208_v47, %v1004_v59 }
 0x1f5   : > { %2788 = vtanh.f32 %v1005_v60 }
 0x1f6   : > { %2790 = vtanh.f32 %v1010_v58 }
 0x1f7   : > { %v2785_v61 = vpop.eup %2784 }
 0x1f8   : > { %v2787_v62 = vpop.eup %2786  ;;  %2480 = vmatprep.mubr.msk.f32.mxu1 %vm701_vm0, %v2785_v61 }
 0x1f9   : > { %v2432_v63 = vpop.f32.mrb[14].mxu1  ;;  %2481 = vmatmul.mubr.msk.f32.gmra.mrb[42].mxu1 %vm701_vm0, %v2787_v62 }
 0x1fa   : > { %v1020_v0 = vadd.f32 %v2432_v63, %v3208_v47  ;;  %v1014_v1 = vpop.f32.mrb[15].mxu1 }
 0x1fb   : > { %v1015_v2 = vadd.f32 %v3208_v47, %v1014_v1 }
 0x1fd   : > { %2792 = vtanh.f32 %v1015_v2 }
 0x1fe   : > { %2794 = vtanh.f32 %v1020_v0 }
 0x1ff   : > { %v2789_v3 = vpop.eup %2788 }
 0x200   : > { %v2791_v4 = vpop.eup %2790  ;;  %2483 = vmatprep.mubr.msk.f32.mxu1 %vm701_vm0, %v2789_v3 }
 0x201   : > { %2484 = vmatmul.mubr.msk.f32.gmra.mrb[44].mxu1 %vm701_vm0, %v2791_v4 }
 0x207   : > { %v2793_v5 = vpop.eup %2792 }
 0x208   : > { %v2795_v6 = vpop.eup %2794  ;;  %2486 = vmatprep.mubr.msk.f32.mxu1 %vm701_vm0, %v2793_v5 }
 0x209   : > { %2487 = vmatmul.mubr.msk.f32.gmra.mrb[46].mxu1 %vm701_vm0, %v2795_v6 }
 0x265   : > { %v2443_v47 = vpop.f32.mrb[16].mxu1 }
 0x266   : > { %v1236_v8 = vadd.f32 %v2443_v47, %v3289_v7  ;;  %v1230_v9 = vpop.f32.mrb[17].mxu1 }
 0x267   : > { %v1231_v10 = vadd.f32 %v3289_v7, %v1230_v9 }
 0x269   : > { %2796 = vtanh.f32 %v1231_v10 }
 0x26a   : > { %2798 = vtanh.f32 %v1236_v8 }
 0x26c   : > { %v2446_v11 = vpop.f32.mrb[18].mxu1 }
 0x26d   : > { %v1246_v12 = vadd.f32 %v2446_v11, %v3289_v7  ;;  %v1240_v13 = vpop.f32.mrb[19].mxu1 }
 0x26e   : > { %v1241_v14 = vadd.f32 %v3289_v7, %v1240_v13 }
 0x270   : > { %2800 = vtanh.f32 %v1241_v14 }
 0x271   : > { %2802 = vtanh.f32 %v1246_v12 }
 0x273   : > { %v2797_v15 = vpop.eup %2796 }
 0x274   : > { %v2799_v16 = vpop.eup %2798  ;;  %2497 = vmatprep.mubr.msk.f32.mxu0 %vm701_vm0, %v2797_v15  ;;  %v2449_v17 = vpop.f32.mrb[20].mxu1 }
 0x275   : > { %v1256_v18 = vadd.f32 %v2449_v17, %v3289_v7  ;;  %2498 = vmatmul.mubr.msk.f32.vlgmr.msra.gmra.mrb[16].mxu0 %vm701_vm0, %v2799_v16  ;;  %v1250_v19 = vpop.f32.mrb[21].mxu1 }
 0x276   : > { %v1251_v20 = vadd.f32 %v3289_v7, %v1250_v19 }
 0x278   : > { %2804 = vtanh.f32 %v1251_v20 }
 0x279   : > { %2806 = vtanh.f32 %v1256_v18 }
 0x27a   : > { %v2801_v21 = vpop.eup %2800 }
 0x27b   : > { %v2803_v22 = vpop.eup %2802  ;;  %2500 = vmatprep.mubr.msk.f32.mxu0 %vm701_vm0, %v2801_v21 }
 0x27c   : > { %v2452_v23 = vpop.f32.mrb[22].mxu1  ;;  %2501 = vmatmul.mubr.msk.f32.gmra.mrb[18].mxu0 %vm701_vm0, %v2803_v22 }
 0x27d   : > { %v1266_v24 = vadd.f32 %v2452_v23, %v3289_v7  ;;  %v1260_v25 = vpop.f32.mrb[23].mxu1 }
 0x27e   : > { %v1261_v26 = vadd.f32 %v3289_v7, %v1260_v25 }
 0x280   : > { %2808 = vtanh.f32 %v1261_v26 }
 0x281   : > { %2810 = vtanh.f32 %v1266_v24 }
 0x282   : > { %v2805_v27 = vpop.eup %2804 }
 0x283   : > { %v2807_v28 = vpop.eup %2806  ;;  %2503 = vmatprep.mubr.msk.f32.mxu0 %vm701_vm0, %v2805_v27 }
 0x284   : > { %v2455_v48 = vpop.f32.mrb[24].mxu1  ;;  %2504 = vmatmul.mubr.msk.f32.gmra.mrb[20].mxu0 %vm701_vm0, %v2807_v28 }
 0x285   : > { %v1276_v29 = vadd.f32 %v2455_v48, %v3289_v7  ;;  %v1270_v30 = vpop.f32.mrb[25].mxu1 }
 0x286   : > { %v1271_v55 = vadd.f32 %v3289_v7, %v1270_v30 }
 0x288   : > { %2812 = vtanh.f32 %v1271_v55 }
 0x289   : > { %2814 = vtanh.f32 %v1276_v29 }
 0x28a   : > { %v2809_v31 = vpop.eup %2808 }
 0x28b   : > { %v2811_v32 = vpop.eup %2810  ;;  %2506 = vmatprep.mubr.msk.f32.mxu0 %vm701_vm0, %v2809_v31 }
 0x28c   : > { %v2458_v33 = vpop.f32.mrb[26].mxu1  ;;  %2507 = vmatmul.mubr.msk.f32.gmra.mrb[22].mxu0 %vm701_vm0, %v2811_v32 }
 0x28d   : > { %v1286_v34 = vadd.f32 %v2458_v33, %v3289_v7  ;;  %v1280_v35 = vpop.f32.mrb[27].mxu1 }
 0x28e   : > { %v1281_v36 = vadd.f32 %v3289_v7, %v1280_v35 }
 0x290   : > { %2816 = vtanh.f32 %v1281_v36 }
 0x291   : > { %2818 = vtanh.f32 %v1286_v34 }
 0x292   : > { %v2813_v37 = vpop.eup %2812 }
 0x293   : > { %v2815_v38 = vpop.eup %2814  ;;  %2509 = vmatprep.mubr.msk.f32.mxu0 %vm701_vm0, %v2813_v37 }
 0x294   : > { %v2461_v39 = vpop.f32.mrb[28].mxu1  ;;  %2510 = vmatmul.mubr.msk.f32.gmra.mrb[24].mxu0 %vm701_vm0, %v2815_v38 }
 0x295   : > { %v1296_v40 = vadd.f32 %v2461_v39, %v3289_v7  ;;  %v1290_v41 = vpop.f32.mrb[29].mxu1 }
 0x296   : > { %v1291_v42 = vadd.f32 %v3289_v7, %v1290_v41 }
 0x298   : > { %2820 = vtanh.f32 %v1291_v42 }
 0x299   : > { %2822 = vtanh.f32 %v1296_v40 }
 0x29a   : > { %v2817_v43 = vpop.eup %2816 }
 0x29b   : > { %v2819_v44 = vpop.eup %2818  ;;  %2512 = vmatprep.mubr.msk.f32.mxu0 %vm701_vm0, %v2817_v43 }
 0x29c   : > { %v2464_v45 = vpop.f32.mrb[30].mxu1  ;;  %2513 = vmatmul.mubr.msk.f32.gmra.mrb[26].mxu0 %vm701_vm0, %v2819_v44 }
 0x29d   : > { %v1306_v46 = vadd.f32 %v2464_v45, %v3289_v7  ;;  %v1300_v49 = vpop.f32.mrb[31].mxu1 }
 0x29e   : > { %v1301_v50 = vadd.f32 %v3289_v7, %v1300_v49 }
 0x2a0   : > { %2824 = vtanh.f32 %v1301_v50 }
 0x2a1   : > { %2826 = vtanh.f32 %v1306_v46 }
 0x2a2   : > { %v2821_v51 = vpop.eup %2820 }
 0x2a3   : > { %v2823_v52 = vpop.eup %2822  ;;  %2515 = vmatprep.mubr.msk.f32.mxu0 %vm701_vm0, %v2821_v51 }
 0x2a4   : > { %v2467_v53 = vpop.f32.mrb[32].mxu1  ;;  %2516 = vmatmul.mubr.msk.f32.gmra.mrb[28].mxu0 %vm701_vm0, %v2823_v52 }
 0x2a5   : > { %v1316_v54 = vadd.f32 %v2467_v53, %v3289_v7  ;;  %v1310_v56 = vpop.f32.mrb[33].mxu1 }
 0x2a6   : > { %v1311_v57 = vadd.f32 %v3289_v7, %v1310_v56 }
 0x2a8   : > { %2828 = vtanh.f32 %v1311_v57 }
 0x2a9   : > { %2830 = vtanh.f32 %v1316_v54 }
 0x2aa   : > { %v2825_v58 = vpop.eup %2824 }
 0x2ab   : > { %v2827_v59 = vpop.eup %2826  ;;  %2518 = vmatprep.mubr.msk.f32.mxu0 %vm701_vm0, %v2825_v58 }
 0x2ac   : > { %v2470_v60 = vpop.f32.mrb[34].mxu1  ;;  %2519 = vmatmul.mubr.msk.f32.gmra.mrb[30].mxu0 %vm701_vm0, %v2827_v59 }
 0x2ad   : > { %v1326_v61 = vadd.f32 %v2470_v60, %v3289_v7  ;;  %v1320_v62 = vpop.f32.mrb[35].mxu1 }
 0x2ae   : > { %v1321_v63 = vadd.f32 %v3289_v7, %v1320_v62 }
 0x2b0   : > { %2832 = vtanh.f32 %v1321_v63 }
 0x2b1   : > { %2834 = vtanh.f32 %v1326_v61 }
 0x2b2   : > { %v2829_v0 = vpop.eup %2828 }
 0x2b3   : > { %v2831_v1 = vpop.eup %2830  ;;  %2521 = vmatprep.mubr.msk.f32.mxu0 %vm701_vm0, %v2829_v0 }
 0x2b4   : > { %v2473_v2 = vpop.f32.mrb[36].mxu1  ;;  %2522 = vmatmul.mubr.msk.f32.gmra.mrb[32].mxu0 %vm701_vm0, %v2831_v1 }
 0x2b5   : > { %v1336_v3 = vadd.f32 %v2473_v2, %v3289_v7  ;;  %v1330_v4 = vpop.f32.mrb[37].mxu1 }
 0x2b6   : > { %v1331_v5 = vadd.f32 %v3289_v7, %v1330_v4 }
 0x2b8   : > { %2836 = vtanh.f32 %v1331_v5 }
 0x2b9   : > { %2838 = vtanh.f32 %v1336_v3 }
 0x2ba   : > { %v2833_v6 = vpop.eup %2832 }
 0x2bb   : > { %v2835_v47 = vpop.eup %2834  ;;  %2524 = vmatprep.mubr.msk.f32.mxu0 %vm701_vm0, %v2833_v6 }
 0x2bc   : > { %v2476_v8 = vpop.f32.mrb[38].mxu1  ;;  %2525 = vmatmul.mubr.msk.f32.gmra.mrb[34].mxu0 %vm701_vm0, %v2835_v47 }
 0x2bd   : > { %v1346_v9 = vadd.f32 %v2476_v8, %v3289_v7  ;;  %v1340_v10 = vpop.f32.mrb[39].mxu1 }
 0x2be   : > { %v1341_v11 = vadd.f32 %v3289_v7, %v1340_v10 }
 0x2c0   : > { %2840 = vtanh.f32 %v1341_v11 }
 0x2c1   : > { %2842 = vtanh.f32 %v1346_v9 }
 0x2c2   : > { %v2837_v12 = vpop.eup %2836 }
 0x2c3   : > { %v2839_v13 = vpop.eup %2838  ;;  %2527 = vmatprep.mubr.msk.f32.mxu0 %vm701_vm0, %v2837_v12 }
 0x2c4   : > { %v2479_v14 = vpop.f32.mrb[40].mxu1  ;;  %2528 = vmatmul.mubr.msk.f32.gmra.mrb[36].mxu0 %vm701_vm0, %v2839_v13 }
 0x2c5   : > { %v1356_v15 = vadd.f32 %v2479_v14, %v3289_v7  ;;  %v1350_v16 = vpop.f32.mrb[41].mxu1 }
 0x2c6   : > { %v1351_v17 = vadd.f32 %v3289_v7, %v1350_v16 }
 0x2c8   : > { %2844 = vtanh.f32 %v1351_v17 }
 0x2c9   : > { %2846 = vtanh.f32 %v1356_v15 }
 0x2ca   : > { %v2841_v18 = vpop.eup %2840 }
 0x2cb   : > { %v2843_v19 = vpop.eup %2842  ;;  %2530 = vmatprep.mubr.msk.f32.mxu0 %vm701_vm0, %v2841_v18 }
 0x2cc   : > { %v2482_v20 = vpop.f32.mrb[42].mxu1  ;;  %2531 = vmatmul.mubr.msk.f32.gmra.mrb[38].mxu0 %vm701_vm0, %v2843_v19 }
 0x2cd   : > { %v1366_v21 = vadd.f32 %v2482_v20, %v3289_v7  ;;  %v1360_v22 = vpop.f32.mrb[43].mxu1 }
 0x2ce   : > { %v1361_v23 = vadd.f32 %v3289_v7, %v1360_v22 }
 0x2d0   : > { %2848 = vtanh.f32 %v1361_v23 }
 0x2d1   : > { %2850 = vtanh.f32 %v1366_v21 }
 0x2d2   : > { %v2845_v24 = vpop.eup %2844 }
 0x2d3   : > { %v2847_v25 = vpop.eup %2846  ;;  %2533 = vmatprep.mubr.msk.f32.mxu0 %vm701_vm0, %v2845_v24 }
 0x2d4   : > { %v2485_v26 = vpop.f32.mrb[44].mxu1  ;;  %2534 = vmatmul.mubr.msk.f32.gmra.mrb[40].mxu0 %vm701_vm0, %v2847_v25 }
 0x2d5   : > { %v1376_v27 = vadd.f32 %v2485_v26, %v3289_v7  ;;  %v1370_v28 = vpop.f32.mrb[45].mxu1 }
 0x2d6   : > { %v1371_v48 = vadd.f32 %v3289_v7, %v1370_v28 }
 0x2d8   : > { %2852 = vtanh.f32 %v1371_v48 }
 0x2d9   : > { %2854 = vtanh.f32 %v1376_v27 }
 0x2da   : > { %v2849_v29 = vpop.eup %2848 }
 0x2db   : > { %v2851_v30 = vpop.eup %2850  ;;  %2536 = vmatprep.mubr.msk.f32.mxu0 %vm701_vm0, %v2849_v29 }
 0x2dc   : > { %v2488_v55 = vpop.f32.mrb[46].mxu1  ;;  %2537 = vmatmul.mubr.msk.f32.gmra.mrb[42].mxu0 %vm701_vm0, %v2851_v30 }
 0x2dd   : > { %v1386_v31 = vadd.f32 %v2488_v55, %v3289_v7  ;;  %v1380_v32 = vpop.f32.mrb[47].mxu1 }
 0x2de   : > { %v1381_v33 = vadd.f32 %v3289_v7, %v1380_v32  ;;  %v3359_v7 = vld [vmem:[%s3600_s2 + $0x3] ss:$0 sm:$0xff] }
 0x2e0   : > { %2856 = vtanh.f32 %v1381_v33 }
 0x2e1   : > { %2858 = vtanh.f32 %v1386_v31 }
 0x2e2   : > { %v2853_v34 = vpop.eup %2852 }
 0x2e3   : > { %v2855_v35 = vpop.eup %2854  ;;  %2539 = vmatprep.mubr.msk.f32.mxu0 %vm701_vm0, %v2853_v34 }
 0x2e4   : > { %2540 = vmatmul.mubr.msk.f32.gmra.mrb[44].mxu0 %vm701_vm0, %v2855_v35 }
 0x2ea   : > { %v2857_v36 = vpop.eup %2856 }
 0x2eb   : > { %v2859_v37 = vpop.eup %2858  ;;  %2542 = vmatprep.mubr.msk.f32.mxu0 %vm701_vm0, %v2857_v36 }
 0x2ec   : > { %2543 = vmatmul.mubr.msk.f32.gmra.mrb[46].mxu0 %vm701_vm0, %v2859_v37 }
 0x348   : > { %v2499_v38 = vpop.f32.mrb[16].mxu0 }
 0x349   : > { %v1602_v39 = vadd.f32 %v2499_v38, %v3359_v7  ;;  %v1596_v40 = vpop.f32.mrb[17].mxu0 }
 0x34a   : > { %v1597_v41 = vadd.f32 %v3359_v7, %v1596_v40 }
 0x34b   : > { %1757 = vst.msk [vmem:[%s3363_s23 + $0x8] sm:$0xff] %vm1755_vm1, %v1602_v39 }
 0x34c   : > { %1756 = vst.msk [vmem:[%s3363_s23] sm:$0xff] %vm1755_vm1, %v1597_v41 }
 0x34f   : > { %v2502_v42 = vpop.f32.mrb[18].mxu0 }
 0x350   : > { %v1612_v43 = vadd.f32 %v2502_v42, %v3359_v7  ;;  %v1606_v44 = vpop.f32.mrb[19].mxu0 }
 0x351   : > { %v1607_v45 = vadd.f32 %v3359_v7, %v1606_v44 }
 0x352   : > { %1759 = vst.msk [vmem:[%s3363_s23 + $0x18] sm:$0xff] %vm1755_vm1, %v1612_v43 }
 0x353   : > { %1758 = vst.msk [vmem:[%s3363_s23 + $0x10] sm:$0xff] %vm1755_vm1, %v1607_v45 }
 0x357   : > { %v2505_v46 = vpop.f32.mrb[20].mxu0 }
 0x358   : > { %v1622_v49 = vadd.f32 %v2505_v46, %v3359_v7  ;;  %v1616_v50 = vpop.f32.mrb[21].mxu0 }
 0x359   : > { %v1617_v51 = vadd.f32 %v3359_v7, %v1616_v50 }
 0x35a   : > { %1761 = vst.msk [vmem:[%s3363_s23 + $0x28] sm:$0xff] %vm1755_vm1, %v1622_v49 }
 0x35b   : > { %1760 = vst.msk [vmem:[%s3363_s23 + $0x20] sm:$0xff] %vm1755_vm1, %v1617_v51 }
 0x35f   : > { %v2508_v52 = vpop.f32.mrb[22].mxu0 }
 0x360   : > { %v1632_v53 = vadd.f32 %v2508_v52, %v3359_v7  ;;  %v1626_v54 = vpop.f32.mrb[23].mxu0 }
 0x361   : > { %v1627_v56 = vadd.f32 %v3359_v7, %v1626_v54 }
 0x362   : > { %1763 = vst.msk [vmem:[%s3363_s23 + $0x38] sm:$0xff] %vm1755_vm1, %v1632_v53 }
 0x363   : > { %1762 = vst.msk [vmem:[%s3363_s23 + $0x30] sm:$0xff] %vm1755_vm1, %v1627_v56 }
 0x367   : > { %v2511_v57 = vpop.f32.mrb[24].mxu0 }
 0x368   : > { %v1642_v58 = vadd.f32 %v2511_v57, %v3359_v7  ;;  %v1636_v59 = vpop.f32.mrb[25].mxu0 }
 0x369   : > { %v1637_v60 = vadd.f32 %v3359_v7, %v1636_v59 }
 0x36a   : > { %1765 = vst.msk [vmem:[%s3363_s23 + $0x48] sm:$0xff] %vm1755_vm1, %v1642_v58 }
 0x36b   : > { %1764 = vst.msk [vmem:[%s3363_s23 + $0x40] sm:$0xff] %vm1755_vm1, %v1637_v60 }
 0x36f   : > { %v2514_v61 = vpop.f32.mrb[26].mxu0 }
 0x370   : > { %v1652_v62 = vadd.f32 %v2514_v61, %v3359_v7  ;;  %v1646_v63 = vpop.f32.mrb[27].mxu0 }
 0x371   : > { %v1647_v0 = vadd.f32 %v3359_v7, %v1646_v63 }
 0x372   : > { %1767 = vst.msk [vmem:[%s3363_s23 + $0x58] sm:$0xff] %vm1755_vm1, %v1652_v62 }
 0x373   : > { %1766 = vst.msk [vmem:[%s3363_s23 + $0x50] sm:$0xff] %vm1755_vm1, %v1647_v0 }
 0x377   : > { %v2517_v1 = vpop.f32.mrb[28].mxu0 }
 0x378   : > { %v1662_v2 = vadd.f32 %v2517_v1, %v3359_v7  ;;  %v1656_v3 = vpop.f32.mrb[29].mxu0 }
 0x379   : > { %v1657_v4 = vadd.f32 %v3359_v7, %v1656_v3 }
 0x37a   : > { %1769 = vst.msk [vmem:[%s3363_s23 + $0x68] sm:$0xff] %vm1755_vm1, %v1662_v2 }
 0x37b   : > { %1768 = vst.msk [vmem:[%s3363_s23 + $0x60] sm:$0xff] %vm1755_vm1, %v1657_v4 }
 0x37f   : > { %v2520_v5 = vpop.f32.mrb[30].mxu0 }
 0x380   : > { %v1672_v6 = vadd.f32 %v2520_v5, %v3359_v7  ;;  %v1666_v47 = vpop.f32.mrb[31].mxu0 }
 0x381   : > { %v1667_v8 = vadd.f32 %v3359_v7, %v1666_v47 }
 0x382   : > { %1771 = vst.msk [vmem:[%s3363_s23 + $0x78] sm:$0xff] %vm1755_vm1, %v1672_v6 }
 0x383   : > { %1770 = vst.msk [vmem:[%s3363_s23 + $0x70] sm:$0xff] %vm1755_vm1, %v1667_v8 }
 0x387   : > { %v2523_v9 = vpop.f32.mrb[32].mxu0 }
 0x388   : > { %v1682_v10 = vadd.f32 %v2523_v9, %v3359_v7  ;;  %v1676_v11 = vpop.f32.mrb[33].mxu0 }
 0x389   : > { %v1677_v12 = vadd.f32 %v3359_v7, %v1676_v11 }
 0x38a   : > { %1773 = vst.msk [vmem:[%s3363_s23 + $0x88] sm:$0xff] %vm1755_vm1, %v1682_v10 }
 0x38b   : > { %1772 = vst.msk [vmem:[%s3363_s23 + $0x80] sm:$0xff] %vm1755_vm1, %v1677_v12 }
 0x38f   : > { %v2526_v13 = vpop.f32.mrb[34].mxu0 }
 0x390   : > { %v1692_v14 = vadd.f32 %v2526_v13, %v3359_v7  ;;  %v1686_v15 = vpop.f32.mrb[35].mxu0 }
 0x391   : > { %v1687_v16 = vadd.f32 %v3359_v7, %v1686_v15 }
 0x392   : > { %1775 = vst.msk [vmem:[%s3363_s23 + $0x98] sm:$0xff] %vm1755_vm1, %v1692_v14 }
 0x393   : > { %1774 = vst.msk [vmem:[%s3363_s23 + $0x90] sm:$0xff] %vm1755_vm1, %v1687_v16 }
 0x397   : > { %v2529_v17 = vpop.f32.mrb[36].mxu0 }
 0x398   : > { %v1702_v18 = vadd.f32 %v2529_v17, %v3359_v7  ;;  %v1696_v19 = vpop.f32.mrb[37].mxu0 }
 0x399   : > { %v1697_v20 = vadd.f32 %v3359_v7, %v1696_v19 }
 0x39a   : > { %1777 = vst.msk [vmem:[%s3363_s23 + $0xa8] sm:$0xff] %vm1755_vm1, %v1702_v18 }
 0x39b   : > { %1776 = vst.msk [vmem:[%s3363_s23 + $0xa0] sm:$0xff] %vm1755_vm1, %v1697_v20 }
 0x39f   : > { %v2532_v21 = vpop.f32.mrb[38].mxu0 }
 0x3a0   : > { %v1712_v22 = vadd.f32 %v2532_v21, %v3359_v7  ;;  %v1706_v23 = vpop.f32.mrb[39].mxu0 }
 0x3a1   : > { %v1707_v24 = vadd.f32 %v3359_v7, %v1706_v23 }
 0x3a2   : > { %1779 = vst.msk [vmem:[%s3363_s23 + $0xb8] sm:$0xff] %vm1755_vm1, %v1712_v22 }
 0x3a3   : > { %1778 = vst.msk [vmem:[%s3363_s23 + $0xb0] sm:$0xff] %vm1755_vm1, %v1707_v24 }
 0x3a7   : > { %v2535_v25 = vpop.f32.mrb[40].mxu0 }
 0x3a8   : > { %v1722_v26 = vadd.f32 %v2535_v25, %v3359_v7  ;;  %v1716_v27 = vpop.f32.mrb[41].mxu0 }
 0x3a9   : > { %v1717_v28 = vadd.f32 %v3359_v7, %v1716_v27 }
 0x3aa   : > { %1781 = vst.msk [vmem:[%s3363_s23 + $0xc8] sm:$0xff] %vm1755_vm1, %v1722_v26 }
 0x3ab   : > { %1780 = vst.msk [vmem:[%s3363_s23 + $0xc0] sm:$0xff] %vm1755_vm1, %v1717_v28 }
 0x3af   : > { %v2538_v48 = vpop.f32.mrb[42].mxu0 }
 0x3b0   : > { %v1732_v29 = vadd.f32 %v2538_v48, %v3359_v7  ;;  %v1726_v30 = vpop.f32.mrb[43].mxu0 }
 0x3b1   : > { %v1727_v55 = vadd.f32 %v3359_v7, %v1726_v30 }
 0x3b2   : > { %1783 = vst.msk [vmem:[%s3363_s23 + $0xd8] sm:$0xff] %vm1755_vm1, %v1732_v29 }
 0x3b3   : > { %1782 = vst.msk [vmem:[%s3363_s23 + $0xd0] sm:$0xff] %vm1755_vm1, %v1727_v55 }
 0x3b7   : > { %v2541_v31 = vpop.f32.mrb[44].mxu0 }
 0x3b8   : > { %v1742_v32 = vadd.f32 %v2541_v31, %v3359_v7  ;;  %v1736_v33 = vpop.f32.mrb[45].mxu0 }
 0x3b9   : > { %v1737_v34 = vadd.f32 %v3359_v7, %v1736_v33 }
 0x3ba   : > { %1785 = vst.msk [vmem:[%s3363_s23 + $0xe8] sm:$0xff] %vm1755_vm1, %v1742_v32 }
 0x3bb   : > { %1784 = vst.msk [vmem:[%s3363_s23 + $0xe0] sm:$0xff] %vm1755_vm1, %v1737_v34 }
 0x3bd   : > { %1794 = sbr.rel (!%p2995_p4) target bundleno = 1020 (0x3fc), region = 36 }
 0x3bf   : > { %v2544_v35 = vpop.f32.mrb[46].mxu0 }
 0x3c0   : > { %v1752_v36 = vadd.f32 %v2544_v35, %v3359_v7  ;;  %v1746_v37 = vpop.f32.mrb[47].mxu0 }
 0x3c1   : > { %v1747_v38 = vadd.f32 %v3359_v7, %v1746_v37 }
 0x3c2   : > { %1787 = vst.msk [vmem:[%s3363_s23 + $0xf8] sm:$0xff] %vm1755_vm1, %v1752_v36 }
 0x3c3   : > { %1786 = vst.msk [vmem:[%s3363_s23 + $0xf0] sm:$0xff] %vm1755_vm1, %v1747_v38 }
 0x3c4   : > { %s3612_s12 = smov (!%p1797_p8, %s1796_s12), 32 }
 0x3c5   : > { %s2251_s28 = sshll.u32 %s3612_s12, 7 }
 0x3c6   : > { %p2254_p9 = scmp.eq.s32.totalorder %s2251_s28, 0 }
 0x3c7   : > { %s3472_s29 = sshrl.u32 (!%p2254_p9), %s3612_s12, 5 }
 0x3c8   : > { %1805 = sbr.rel (%p2254_p9) target bundleno = 1020 (0x3fc), region = 40  ;;  %p2255_p10 = scmp.le.s32.totalorder (!%p2254_p9), %s3472_s29, 0 }
 0x3cf   : > { %2083 = sbr.rel (%p2255_p10) target bundleno = 999 (0x3e7), region = 122  ;;  %s3603_s15 = smov (!%p2255_p10), %s3466_s27 }
 0x3d0   : > { %s3604_s20 = smov (!%p2255_p10), %s3363_s23  ;;  %s3481_s21 = smov (!%p2255_p10), 0  }
 0x3d1   : > { %s3483_s30 = smov (!%p2255_p10), 0  }
 0x3d6 LB: >> { %v1929_v7 = vld [vmem:[%s2922_s20] sm:$0xff]  ;;  %v1931_v39 = vld [vmem:[%s2922_s20 + $0x8] sm:$0xff]  ;;  %v1933_v40 = vld [vmem:[%s2922_s20 + $0x10] sm:$0xff]  ;;  %s1993_s4 = sadd.s32 1, %s2926_s21  ;;  %s1923_s30 = sadd.s32 1, %s2930_s30   ;;  %s2930_s30 = sphi %s3483_s30, %s1923_s30   ;;  %s2926_s21 = sphi %s3481_s21, %s3607_s21   ;;  %s2922_s20 = sphi %s3604_s20, %s3606_s20   ;;  %s2918_s15 = sphi %s3603_s15, %s3605_s15  }
 0x3d7   : >> { %1930 = vst [vmem:[%s2918_s15] sm:$0xff] %v1929_v7  ;;  %1932 = vst [vmem:[%s2918_s15 + $0x8] sm:$0xff] %v1931_v39  ;;  %v1935_v41 = vld [vmem:[%s2922_s20 + $0x18] sm:$0xff]  ;;  %v1937_v42 = vld [vmem:[%s2922_s20 + $0x20] sm:$0xff]  ;;  %p1994_p11 = scmp.ge.s32.totalorder %s1993_s4, %s3472_s29  ;;  %p1922_p12 = scmp.ge.s32.totalorder %s1923_s30, %s3472_s29 }
 0x3d8   : >> { %1934 = vst [vmem:[%s2918_s15 + $0x10] sm:$0xff] %v1933_v40  ;;  %v1939_v43 = vld [vmem:[%s2922_s20 + $0x28] sm:$0xff]  ;;  %1936 = vst [vmem:[%s2918_s15 + $0x18] sm:$0xff] %v1935_v41  ;;  %v1941_v44 = vld [vmem:[%s2922_s20 + $0x30] sm:$0xff] }
 0x3d9   : >> { %1938 = vst [vmem:[%s2918_s15 + $0x20] sm:$0xff] %v1937_v42  ;;  %1940 = vst [vmem:[%s2918_s15 + $0x28] sm:$0xff] %v1939_v43  ;;  %v1943_v45 = vld [vmem:[%s2922_s20 + $0x38] sm:$0xff]  ;;  %v1945_v46 = vld [vmem:[%s2922_s20 + $0x40] sm:$0xff]  ;;  %s3614_s4 = smov (%p1994_p11, %s1993_s4), 0 }
 0x3da   : >> { %1942 = vst [vmem:[%s2918_s15 + $0x30] sm:$0xff] %v1941_v44  ;;  %1944 = vst [vmem:[%s2918_s15 + $0x38] sm:$0xff] %v1943_v45  ;;  %v1947_v49 = vld [vmem:[%s2922_s20 + $0x48] sm:$0xff]  ;;  %v1949_v50 = vld [vmem:[%s2922_s20 + $0x50] sm:$0xff]  ;;  %s2256_s5 = sshll.u32 %s3614_s4, 8  ;;  %s3607_s21 = smov %s3614_s4 }
 0x3db   : >> { %1946 = vst [vmem:[%s2918_s15 + $0x40] sm:$0xff] %v1945_v46  ;;  %v1951_v51 = vld [vmem:[%s2922_s20 + $0x58] sm:$0xff]  ;;  %1948 = vst [vmem:[%s2918_s15 + $0x48] sm:$0xff] %v1947_v49  ;;  %v1953_v52 = vld [vmem:[%s2922_s20 + $0x60] sm:$0xff]  ;;  %s3539_s6 = scalar_lea.vmem %s3363_s23, %s2256_s5 [#allocation2]   ;;  %s1999_s7 = scalar_lea.vmem %s3466_s27, %s2256_s5  }
 0x3dc   : >> { %1950 = vst [vmem:[%s2918_s15 + $0x50] sm:$0xff] %v1949_v50  ;;  %1952 = vst [vmem:[%s2918_s15 + $0x58] sm:$0xff] %v1951_v51  ;;  %v1955_v53 = vld [vmem:[%s2922_s20 + $0x68] sm:$0xff]  ;;  %v1957_v54 = vld [vmem:[%s2922_s20 + $0x70] sm:$0xff] }
 0x3dd   : >> { %1954 = vst [vmem:[%s2918_s15 + $0x60] sm:$0xff] %v1953_v52  ;;  %1956 = vst [vmem:[%s2918_s15 + $0x68] sm:$0xff] %v1955_v53  ;;  %v1959_v56 = vld [vmem:[%s2922_s20 + $0x78] sm:$0xff]  ;;  %v1961_v57 = vld [vmem:[%s2922_s20 + $0x80] sm:$0xff] }
 0x3de   : >> { %1958 = vst [vmem:[%s2918_s15 + $0x70] sm:$0xff] %v1957_v54  ;;  %v1963_v58 = vld [vmem:[%s2922_s20 + $0x88] sm:$0xff]  ;;  %1960 = vst [vmem:[%s2918_s15 + $0x78] sm:$0xff] %v1959_v56  ;;  %v1965_v59 = vld [vmem:[%s2922_s20 + $0x90] sm:$0xff] }
 0x3df   : >> { %1962 = vst [vmem:[%s2918_s15 + $0x80] sm:$0xff] %v1961_v57  ;;  %1964 = vst [vmem:[%s2918_s15 + $0x88] sm:$0xff] %v1963_v58  ;;  %v1967_v60 = vld [vmem:[%s2922_s20 + $0x98] sm:$0xff]  ;;  %v1969_v61 = vld [vmem:[%s2922_s20 + $0xa0] sm:$0xff] }
 0x3e0   : >> { %1966 = vst [vmem:[%s2918_s15 + $0x90] sm:$0xff] %v1965_v59  ;;  %1968 = vst [vmem:[%s2918_s15 + $0x98] sm:$0xff] %v1967_v60  ;;  %v1971_v62 = vld [vmem:[%s2922_s20 + $0xa8] sm:$0xff]  ;;  %v1973_v63 = vld [vmem:[%s2922_s20 + $0xb0] sm:$0xff]  ;;  %1925 = sbr.rel (!%p1922_p12) target bundleno = 982 (0x3d6), region = 128 }
 0x3e1   : >> { %1970 = vst [vmem:[%s2918_s15 + $0xa0] sm:$0xff] %v1969_v61  ;;  %v1975_v0 = vld [vmem:[%s2922_s20 + $0xb8] sm:$0xff]  ;;  %1972 = vst [vmem:[%s2918_s15 + $0xa8] sm:$0xff] %v1971_v62  ;;  %v1977_v1 = vld [vmem:[%s2922_s20 + $0xc0] sm:$0xff] }
 0x3e2   : >> { %1974 = vst [vmem:[%s2918_s15 + $0xb0] sm:$0xff] %v1973_v63  ;;  %1976 = vst [vmem:[%s2918_s15 + $0xb8] sm:$0xff] %v1975_v0  ;;  %v1979_v2 = vld [vmem:[%s2922_s20 + $0xc8] sm:$0xff]  ;;  %v1981_v3 = vld [vmem:[%s2922_s20 + $0xd0] sm:$0xff] }
 0x3e3   : >> { %1978 = vst [vmem:[%s2918_s15 + $0xc0] sm:$0xff] %v1977_v1  ;;  %1980 = vst [vmem:[%s2918_s15 + $0xc8] sm:$0xff] %v1979_v2  ;;  %v1983_v4 = vld [vmem:[%s2922_s20 + $0xd8] sm:$0xff]  ;;  %v1985_v5 = vld [vmem:[%s2922_s20 + $0xe0] sm:$0xff] }
 0x3e4   : >> { %1982 = vst [vmem:[%s2918_s15 + $0xd0] sm:$0xff] %v1981_v3  ;;  %v1987_v6 = vld [vmem:[%s2922_s20 + $0xe8] sm:$0xff]  ;;  %1984 = vst [vmem:[%s2918_s15 + $0xd8] sm:$0xff] %v1983_v4  ;;  %v1989_v47 = vld [vmem:[%s2922_s20 + $0xf0] sm:$0xff] }
 0x3e5   : >> { %1986 = vst [vmem:[%s2918_s15 + $0xe0] sm:$0xff] %v1985_v5  ;;  %1988 = vst [vmem:[%s2918_s15 + $0xe8] sm:$0xff] %v1987_v6  ;;  %v1991_v8 = vld [vmem:[%s2922_s20 + $0xf8] sm:$0xff]  ;;  %s3606_s20 = smov %s3539_s6 }
 0x3e6   : >> { %1990 = vst [vmem:[%s2918_s15 + $0xf0] sm:$0xff] %v1989_v47  ;;  %1992 = vst [vmem:[%s2918_s15 + $0xf8] sm:$0xff] %v1991_v8  ;;  %s3605_s15 = smov %s1999_s7 }
 0x3e7 PF: > { %s3580_s8 = sand.u32 31, %s3612_s12   ;;  %s2267_s9 = sshll.u32 %s3472_s29, 8 }
 0x3e8   : > { %s2004_s10 = scalar_lea.vmem %s3363_s23, %s2267_s9 [#allocation2]   ;;  %s2006_s11 = scalar_lea.vmem %s3466_s27, %s2267_s9  }
 0x3e9   : > { %p2261_p13 = scmp.le.s32.totalorder %s3580_s8, 0 }
 0x3ea   : > { %s2932_s14 = smov (!%p2261_p13), %s2006_s11   ;;  %s2936_s17 = smov (!%p2261_p13), %s2004_s10  }
 0x3eb   : > { %2097 = sbr.rel (%p2261_p13) target bundleno = 1020 (0x3fc), region = 133  ;;  %s2940_s18 = smov (!%p2261_p13), 0  }
 0x3ec   : > { %s2944_s22 = smov (!%p2261_p13), 0  }
 0x3f2 LB: >> { %v2016_v9 = vld [vmem:[%s2938_s17] sm:$0xff]  ;;  %s2018_s12 = sadd.s32 1, %s2942_s18  ;;  %s2010_s22 = sadd.s32 1, %s2946_s22   ;;  %s2946_s22 = sphi %s2944_s22, %s2010_s22   ;;  %s2942_s18 = sphi %s2940_s18, %s2941_s18   ;;  %s2938_s17 = sphi %s2936_s17, %s2023_s17   ;;  %s2934_s14 = sphi %s2932_s14, %s2024_s14  }
 0x3f3   : >> { %2017 = vst [vmem:[%s2934_s14] sm:$0xff] %v2016_v9  ;;  %p2019_p0 = scmp.ge.s32.totalorder %s2018_s12, %s3580_s8  ;;  %p2009_p1 = scmp.ge.s32.totalorder %s2010_s22, %s3580_s8 }
 0x3f5   : >> { %s3616_s12 = smov (%p2019_p0, %s2018_s12), 0  ;;  %2012 = sbr.rel (!%p2009_p1) target bundleno = 1010 (0x3f2), region = 139 }
 0x3f6   : >> { %s2262_s23 = sshll.u32 %s3616_s12, 3  ;;  %s2941_s18 = smov %s3616_s12  }
 0x3f7   : >> { %s2023_s17 = scalar_lea.vmem %s2004_s10, %s2262_s23 [#allocation2]   ;;  %s2024_s14 = scalar_lea.vmem %s2006_s11, %s2262_s23  }
 0x3fc PF: > { %p10_p2 = scmp.ge.s32.totalorder %s2985_s16, 4   ;;  %s3608_s12 = smov %s2910_s13 }
 0x3fd   : > { %s3609_s13 = smov %s2993_s19  ;;  %s3610_s14 = smov %s2985_s16 }
 0x3fe   :  { %12 = sbr.rel (!%p10_p2) target bundleno = 2 (0x2), region = 150 }

</bundles_post_ra>
